<compile_context>
chip_gen: v5e
topology: v5e:2x2
jax: 0.10.0
libtpu: 0.0.40
codegen_flags: <defaults>
</compile_context>

<pallas_src>
import functools

import jax
import jax.numpy as jnp
from jax.experimental import pallas as pl
from jax.experimental.pallas import tpu as pltpu


# ---------------------------------------------------------------------------
# Fused kernel
# ---------------------------------------------------------------------------

def _temporal_block_kernel(halo_ref, x_ref, w1_ref, b1_ref, w2_ref, b2_ref, *rest,
                           n_taps, dilation, seq_tile, x_halo, h_ext,
                           has_downsample):
    """conv1+ReLU -> conv2+ReLU -> (+ residual) -> ReLU for one (TL, C) tile."""
    if has_downsample:
        wd_ref, bd_ref, o_ref, xw_ref, hw_ref = rest
    else:
        wd_ref = bd_ref = None
        o_ref, xw_ref, hw_ref = rest

    i = pl.program_id(1)
    TL, HP, HE = seq_tile, x_halo, h_ext
    K, d = n_taps, dilation
    H = (K - 1) * d
    c_out = o_ref.shape[-1]

    # ---- causal x window in VMEM scratch: rows [t0 - HP, t0 + TL) ----------
    @pl.when(i > 0)
    def _():
        xw_ref[pl.ds(0, HP), :] = halo_ref[0]

    @pl.when(i == 0)                       # conv1's causal left zero padding of x
    def _():
        xw_ref[pl.ds(0, HP), :] = jnp.zeros((HP, xw_ref.shape[-1]), xw_ref.dtype)

    xw_ref[pl.ds(HP, TL), :] = x_ref[0]

    # ---- conv1 -> chomp -> ReLU over HE + TL rows (HE-row halo recompute) --
    n1 = HE + TL
    base1 = HP - HE - H                    # >= 0 by construction
    acc1 = jnp.zeros((n1, c_out), jnp.float32)
    for k in range(K):                     # static offsets: plain aligned-ish slices
        acc1 = acc1 + jnp.dot(xw_ref[pl.ds(base1 + k * d, n1), :], w1_ref[k],
                              preferred_element_type=jnp.float32)
    hw_ref[...] = jnp.maximum(acc1 + b1_ref[...], 0.0).astype(hw_ref.dtype)

    @pl.when(i == 0)                       # conv2's causal left zero padding of h
    def _():
        hw_ref[pl.ds(0, HE), :] = jnp.zeros((HE, c_out), hw_ref.dtype)

    # ---- conv2 -> chomp -> ReLU over the TL output rows ---------------------
    base2 = HE - H                         # >= 0 by construction
    acc2 = jnp.zeros((TL, c_out), jnp.float32)
    for k in range(K):
        acc2 = acc2 + jnp.dot(hw_ref[pl.ds(base2 + k * d, TL), :], w2_ref[k],
                              preferred_element_type=jnp.float32)
    out2 = jnp.maximum(acc2 + b2_ref[...], 0.0)

    # ---- residual (identity or fused 1x1 conv) + final ReLU -----------------
    if has_downsample:
        res = jnp.dot(x_ref[0], wd_ref[...],
                      preferred_element_type=jnp.float32) + bd_ref[...]
    else:
        res = x_ref[0].astype(jnp.float32)
    o_ref[0] = jnp.maximum(out2 + res, 0.0).astype(o_ref.dtype)


# ---------------------------------------------------------------------------
# Host-side wrappers
# ---------------------------------------------------------------------------

def weight_norm_effective(v, g):
    """PyTorch weight_norm(dim=0): w = g * v / ||v||, norm over all dims except 0."""
    norm = jnp.sqrt(jnp.sum(jnp.square(v.astype(jnp.float32)), axis=(1, 2),
                            keepdims=True))
    return (g.reshape(-1, 1, 1).astype(jnp.float32) * v.astype(jnp.float32)
            / norm).astype(v.dtype)


def _round_up(n, m):
    return ((n + m - 1) // m) * m


def _pick_seq_tile(seq_len, halo, preferred, batch):
    """Largest tile that is a multiple of the halo, divides L, and (when possible)
    leaves >= 4 total grid steps so megacore / both v7x TCs stay busy."""
    hi = max(halo, min(preferred, seq_len))
    cands = [t for t in range(halo, hi + 1, halo) if seq_len % t == 0]
    if not cands:
        return 0
    for t in sorted(cands, reverse=True):
        if batch * (seq_len // t) >= 4:
            return t
    return max(cands)


def temporal_block_cl(x, w1, b1, w2, b2, wd=None, bd=None, *, kernel_size, stride,
                      dilation, padding, seq_tile=512):
    """Channels-last TemporalBlock forward.

    x: (B, L, C_in).  w1: (C_out, C_in, K), w2: (C_out, C_out, K) effective
    (post weight-norm) Conv1d weights; wd/bd: optional 1x1 downsample params.
    Returns (B, L, C_out).  Use this entry point for stacked TCN blocks so the
    whole stack stays channels-last (transpose once at network entry/exit)."""
    B, L, C_in = x.shape
    C_out, w1_cin, K = w1.shape
    assert K == kernel_size and w1_cin == C_in and w2.shape == (C_out, C_out, K)
    # TODO(synk): only the standard causal TCN config (stride=1,
    # padding=(K-1)*dilation) is implemented; nn.Dropout is identity (eval mode).
    if stride != 1 or padding != (K - 1) * dilation:
        raise NotImplementedError("only stride=1, padding=(K-1)*dilation supported")

    dtype = x.dtype
    isz = jnp.dtype(dtype).itemsize
    sub = max(8, 8 * (4 // isz))                   # sublane packing: 8/f32, 16/bf16
    H = (K - 1) * dilation                          # causal history per output row
    HE = _round_up(max(H, 1), sub)                  # recomputed-h rows per tile
    HP = _round_up(HE + H, sub)                     # x halo rows from previous tile

    TL = _pick_seq_tile(L, HP, seq_tile, B)
    if TL == 0:
        # TODO(synk): general L needs host-side padding of the time axis.
        raise ValueError(f"L={L} has no tile that is a multiple of the halo {HP}")
    n_tiles = L // TL
    ratio = TL // HP

    # Weights -> (K, C_in, C_out) so each tap is a lane-contraction matmul.
    w1_k = jnp.transpose(w1, (2, 1, 0)).astype(dtype)
    w2_k = jnp.transpose(w2, (2, 1, 0)).astype(dtype)
    b1_k = b1.reshape(1, C_out).astype(jnp.float32)
    b2_k = b2.reshape(1, C_out).astype(jnp.float32)

    cur_map = lambda b, i: (b, i, 0)
    halo_map = lambda b, i: (b, jnp.maximum(i * ratio - 1, 0), 0)
    w_map = lambda b, i: (0, 0, 0)
    c_map = lambda b, i: (0, 0)

    in_specs = [
        pl.BlockSpec((1, HP, C_in), halo_map),      # last HP rows of previous tile
        pl.BlockSpec((1, TL, C_in), cur_map),       # current x tile
        pl.BlockSpec((K, C_in, C_out), w_map),      # resident weights / biases
        pl.BlockSpec((1, C_out), c_map),
        pl.BlockSpec((K, C_out, C_out), w_map),
        pl.BlockSpec((1, C_out), c_map),
    ]
    args = [x, x, w1_k, b1_k, w2_k, b2_k]

    has_ds = wd is not None
    if has_ds:
        wd_k = jnp.transpose(wd[:, :, 0], (1, 0)).astype(dtype)   # (C_in, C_out)
        bd_k = bd.reshape(1, C_out).astype(jnp.float32)
        in_specs += [pl.BlockSpec((C_in, C_out), c_map),
                     pl.BlockSpec((1, C_out), c_map)]
        args += [wd_k, bd_k]
    else:
        assert C_in == C_out, "identity residual requires n_inputs == n_outputs"

    # VMEM budget: double-buffered streamed tiles + window scratch + weights.
    tile_bytes = ((HP + TL) * C_in + TL * C_out) * isz
    scratch_bytes = ((HP + TL) * C_in + (HE + TL) * C_out) * isz
    weight_bytes = ((K * C_in * C_out + K * C_out * C_out) * isz
                    + (C_in * C_out * isz if has_ds else 0) + 4 * C_out * 4)
    working = 2 * tile_bytes + scratch_bytes + 2 * weight_bytes
    vmem_limit = int(min(64 * 2 ** 20, max(32 * 2 ** 20, 2 * working)))

    kernel = functools.partial(
        _temporal_block_kernel, n_taps=K, dilation=dilation, seq_tile=TL,
        x_halo=HP, h_ext=HE, has_downsample=has_ds)

    return pl.pallas_call(
        kernel,
        out_shape=jax.ShapeDtypeStruct((B, L, C_out), dtype),
        grid_spec=pltpu.PrefetchScalarGridSpec(
            num_scalar_prefetch=0,
            grid=(B, n_tiles),
            in_specs=in_specs,
            out_specs=pl.BlockSpec((1, TL, C_out), cur_map),
            scratch_shapes=[pltpu.VMEM((HP + TL, C_in), dtype),    # x window
                            pltpu.VMEM((HE + TL, C_out), dtype)],  # h window
        ),
        compiler_params=pltpu.CompilerParams(
            dimension_semantics=("parallel", "parallel"),
            vmem_limit_bytes=vmem_limit),
    )(*args)


def temporal_block(x, w1, b1, w2, b2, wd=None, bd=None, *, kernel_size, stride,
                   dilation, padding, seq_tile=512):
    """PyTorch-layout wrapper: x (B, C_in, L) -> (B, C_out, L).
    Prefer temporal_block_cl for stacked blocks (transpose once, not per block)."""
    y = temporal_block_cl(jnp.transpose(x, (0, 2, 1)), w1, b1, w2, b2, wd, bd,
                          kernel_size=kernel_size, stride=stride,
                          dilation=dilation, padding=padding, seq_tile=seq_tile)
    return jnp.transpose(y, (0, 2, 1))


# ---------------------------------------------------------------------------
# Pure-JAX reference mirroring the PyTorch forward
# ---------------------------------------------------------------------------

def temporal_block_ref(x, w1, b1, w2, b2, wd, bd, dilation):
    def causal_conv(z, w, b):
        k = w.shape[-1]
        p = (k - 1) * dilation
        y = jax.lax.conv_general_dilated(
            z, w.astype(jnp.float32), window_strides=(1,), padding=[(p, p)],
            rhs_dilation=(dilation,), dimension_numbers=("NCH", "OIH", "NCH"),
            precision=jax.lax.Precision.HIGHEST)
        y = y[:, :, : z.shape[-1]]                   # Chomp1d(padding)
        return y + b.astype(jnp.float32)[None, :, None]

    xf = x.astype(jnp.float32)
    h = jnp.maximum(causal_conv(xf, w1, b1), 0.0)
    out = jnp.maximum(causal_conv(h, w2, b2), 0.0)
    if wd is None:
        res = xf
    else:
        res = jnp.einsum("oc,bcl->bol", wd[:, :, 0].astype(jnp.float32), xf,
                         precision=jax.lax.Precision.HIGHEST)
        res = res + bd.astype(jnp.float32)[None, :, None]
    return jnp.maximum(out + res, 0.0).astype(x.dtype)


# ---------------------------------------------------------------------------
# Demo / self-test
# ---------------------------------------------------------------------------

if __name__ == "__main__":
    key = jax.random.PRNGKey(0)

    def make_conv_params(k, c_out, c_in, ksize):
        kv, kg, kb = jax.random.split(k, 3)
        v = 0.01 * jax.random.normal(kv, (c_out, c_in, ksize), jnp.float32)  # .normal_(0, 0.01)
        g = 1.0 + 0.1 * jax.random.normal(kg, (c_out,), jnp.float32)         # weight_norm gain
        b = 0.1 * jax.random.normal(kb, (c_out,), jnp.float32)
        return weight_norm_effective(v, g), b

    # --- config 1: n_inputs != n_outputs -> 1x1-conv downsample residual ----
    B, C_in, C_out, L = 2, 8, 16, 256
    K, stride, dilation = 3, 1, 2
    padding = (K - 1) * dilation

    key, kx, k1, k2, kdw, kdb = jax.random.split(key, 6)
    x = jax.random.normal(kx, (B, C_in, L), jnp.float32)
    w1, b1 = make_conv_params(k1, C_out, C_in, K)
    w2, b2 = make_conv_params(k2, C_out, C_out, K)
    wd = 0.01 * jax.random.normal(kdw, (C_out, C_in, 1), jnp.float32)
    bd = 0.1 * jax.random.normal(kdb, (C_out,), jnp.float32)

    out = temporal_block(x, w1, b1, w2, b2, wd, bd, kernel_size=K, stride=stride,
                         dilation=dilation, padding=padding)
    out = jax.block_until_ready(out)
    ref = temporal_block_ref(x, w1, b1, w2, b2, wd, bd, dilation)
    assert out.shape == (B, C_out, L)
    assert jnp.allclose(out, ref, atol=2e-3, rtol=2e-3), "mismatch (downsample path)"

    # --- config 2: n_inputs == n_outputs -> identity residual ---------------
    C, dilation2 = 16, 4
    padding2 = (K - 1) * dilation2
    key, kx2, k3, k4 = jax.random.split(key, 4)
    x2 = jax.random.normal(kx2, (B, C, L), jnp.float32)
    w3, b3 = make_conv_params(k3, C, C, K)
    w4, b4 = make_conv_params(k4, C, C, K)

    out2 = temporal_block(x2, w3, b3, w4, b4, None, None, kernel_size=K,
                          stride=stride, dilation=dilation2, padding=padding2)
    out2 = jax.block_until_ready(out2)
    ref2 = temporal_block_ref(x2, w3, b3, w4, b4, None, None, dilation2)
    assert out2.shape == (B, C, L)
    assert jnp.allclose(out2, ref2, atol=2e-3, rtol=2e-3), "mismatch (identity path)"

    print("KERNEL_OK")
</pallas_src>

<mosaic_0001>
module attributes {stable_mosaic.version = 11 : i64} {
  func.func @_temporal_block_kernel(%arg0: i32, %arg1: i32, %arg2: memref<1x16x8xf32, #tpu.memory_space<vmem>>, %arg3: memref<1x128x8xf32, #tpu.memory_space<vmem>>, %arg4: memref<3x8x16xf32, #tpu.memory_space<vmem>>, %arg5: memref<1x16xf32, #tpu.memory_space<vmem>>, %arg6: memref<3x16x16xf32, #tpu.memory_space<vmem>>, %arg7: memref<1x16xf32, #tpu.memory_space<vmem>>, %arg8: memref<8x16xf32, #tpu.memory_space<vmem>>, %arg9: memref<1x16xf32, #tpu.memory_space<vmem>>, %arg10: memref<1x128x16xf32, #tpu.memory_space<vmem>>, %arg11: memref<144x8xf32, #tpu.memory_space<vmem>>, %arg12: memref<136x16xf32, #tpu.memory_space<vmem>>) attributes {dimension_semantics = [#tpu.dimension_semantics<parallel>, #tpu.dimension_semantics<parallel>], iteration_bounds = array<i64: 2, 2>, scalar_prefetch = 0 : i64, scratch_operands = 2 : i64, tpu.core_type = #tpu.core_type<tc>, window_params = [{transform_indices = @transform_0, window_bounds = array<i64: 1, 16, 8>}, {transform_indices = @transform_1, window_bounds = array<i64: 1, 128, 8>}, {pipeline_mode = #tpu.pipeline_mode<synchronous>, transform_indices = @transform_2, window_bounds = array<i64: 3, 8, 16>}, {pipeline_mode = #tpu.pipeline_mode<synchronous>, transform_indices = @transform_3, window_bounds = array<i64: 1, 16>}, {pipeline_mode = #tpu.pipeline_mode<synchronous>, transform_indices = @transform_4, window_bounds = array<i64: 3, 16, 16>}, {pipeline_mode = #tpu.pipeline_mode<synchronous>, transform_indices = @transform_5, window_bounds = array<i64: 1, 16>}, {pipeline_mode = #tpu.pipeline_mode<synchronous>, transform_indices = @transform_6, window_bounds = array<i64: 8, 16>}, {pipeline_mode = #tpu.pipeline_mode<synchronous>, transform_indices = @transform_7, window_bounds = array<i64: 1, 16>}, {transform_indices = @transform_8, window_bounds = array<i64: 1, 128, 16>}]} {
    %c0_i32 = arith.constant 0 : i32
    %0 = arith.cmpi sgt, %arg1, %c0_i32 : i32
    %1 = arith.extui %0 : i1 to i32
    %c0_i32_0 = arith.constant 0 : i32
    %2 = arith.cmpi ne, %1, %c0_i32_0 : i32
    scf.if %2 {
      %c0_60 = arith.constant 0 : index
      %c0_61 = arith.constant 0 : index
      %c0_62 = arith.constant 0 : index
      %68 = vector.load %arg2[%c0_60, %c0_61, %c0_62] : memref<1x16x8xf32, #tpu.memory_space<vmem>>, vector<1x16x8xf32>
      %69 = vector.shape_cast %68 : vector<1x16x8xf32> to vector<16x8xf32>
      %c0_63 = arith.constant 0 : index
      %c0_64 = arith.constant 0 : index
      %70 = vector.load %arg11[%c0_63, %c0_64] : memref<144x8xf32, #tpu.memory_space<vmem>>, vector<16x8xf32>
      tpu.vector_store %arg11[%c0_63, %c0_64], %69 {strides = array<i32>} : memref<144x8xf32, #tpu.memory_space<vmem>>, vector<16x8xf32>,
    } else {
    }
    %c0_i32_1 = arith.constant 0 : i32
    %3 = arith.cmpi eq, %arg1, %c0_i32_1 : i32
    %4 = arith.extui %3 : i1 to i32
    %c0_i32_2 = arith.constant 0 : i32
    %5 = arith.cmpi ne, %4, %c0_i32_2 : i32
    scf.if %5 {
      %cst_60 = arith.constant 0.000000e+00 : f32
      %68 = vector.broadcast %cst_60 : f32 to vector<16x8xf32>
      %c0_61 = arith.constant 0 : index
      %c0_62 = arith.constant 0 : index
      %69 = vector.load %arg11[%c0_61, %c0_62] : memref<144x8xf32, #tpu.memory_space<vmem>>, vector<16x8xf32>
      tpu.vector_store %arg11[%c0_61, %c0_62], %68 {strides = array<i32>} : memref<144x8xf32, #tpu.memory_space<vmem>>, vector<16x8xf32>,
    } else {
    }
    %c0 = arith.constant 0 : index
    %c0_3 = arith.constant 0 : index
    %c0_4 = arith.constant 0 : index
    %6 = vector.load %arg3[%c0, %c0_3, %c0_4] : memref<1x128x8xf32, #tpu.memory_space<vmem>>, vector<1x128x8xf32>
    %7 = vector.shape_cast %6 : vector<1x128x8xf32> to vector<128x8xf32>
    %c16 = arith.constant 16 : index
    %c0_5 = arith.constant 0 : index
    %8 = vector.load %arg11[%c16, %c0_5] : memref<144x8xf32, #tpu.memory_space<vmem>>, vector<128x8xf32>
    tpu.vector_store %arg11[%c16, %c0_5], %7 {strides = array<i32>} : memref<144x8xf32, #tpu.memory_space<vmem>>, vector<128x8xf32>,
    %cst = arith.constant 0.000000e+00 : f32
    %9 = vector.broadcast %cst : f32 to vector<136x16xf32>
    %c4 = arith.constant 4 : index
    %c0_6 = arith.constant 0 : index
    %10 = vector.load %arg11[%c4, %c0_6] : memref<144x8xf32, #tpu.memory_space<vmem>>, vector<136x8xf32>
    %c0_7 = arith.constant 0 : index
    %c0_8 = arith.constant 0 : index
    %c0_9 = arith.constant 0 : index
    %11 = vector.load %arg4[%c0_7, %c0_8, %c0_9] : memref<3x8x16xf32, #tpu.memory_space<vmem>>, vector<1x8x16xf32>
    %12 = vector.shape_cast %11 : vector<1x8x16xf32> to vector<8x16xf32>
    %cst_10 = arith.constant dense<0.000000e+00> : vector<136x16xf32>
    %13 = tpu.matmul %10, %12, %cst_10 {dimension_numbers = #tpu.dot_dimension_numbers<[1], [0], [0], [1], [0, 0, 1, 1], [], []>} : vector<136x8xf32>, vector<8x16xf32>, vector<136x16xf32> -> vector<136x16xf32>
    %14 = arith.addf %9, %13 : vector<136x16xf32>
    %c6 = arith.constant 6 : index
    %c0_11 = arith.constant 0 : index
    %15 = vector.load %arg11[%c6, %c0_11] : memref<144x8xf32, #tpu.memory_space<vmem>>, vector<136x8xf32>
    %c1 = arith.constant 1 : index
    %c0_12 = arith.constant 0 : index
    %c0_13 = arith.constant 0 : index
    %16 = vector.load %arg4[%c1, %c0_12, %c0_13] : memref<3x8x16xf32, #tpu.memory_space<vmem>>, vector<1x8x16xf32>
    %17 = vector.shape_cast %16 : vector<1x8x16xf32> to vector<8x16xf32>
    %cst_14 = arith.constant dense<0.000000e+00> : vector<136x16xf32>
    %18 = tpu.matmul %15, %17, %cst_14 {dimension_numbers = #tpu.dot_dimension_numbers<[1], [0], [0], [1], [0, 0, 1, 1], [], []>} : vector<136x8xf32>, vector<8x16xf32>, vector<136x16xf32> -> vector<136x16xf32>
    %19 = arith.addf %14, %18 : vector<136x16xf32>
    %c8 = arith.constant 8 : index
    %c0_15 = arith.constant 0 : index
    %20 = vector.load %arg11[%c8, %c0_15] : memref<144x8xf32, #tpu.memory_space<vmem>>, vector<136x8xf32>
    %c2 = arith.constant 2 : index
    %c0_16 = arith.constant 0 : index
    %c0_17 = arith.constant 0 : index
    %21 = vector.load %arg4[%c2, %c0_16, %c0_17] : memref<3x8x16xf32, #tpu.memory_space<vmem>>, vector<1x8x16xf32>
    %22 = vector.shape_cast %21 : vector<1x8x16xf32> to vector<8x16xf32>
    %cst_18 = arith.constant dense<0.000000e+00> : vector<136x16xf32>
    %23 = tpu.matmul %20, %22, %cst_18 {dimension_numbers = #tpu.dot_dimension_numbers<[1], [0], [0], [1], [0, 0, 1, 1], [], []>} : vector<136x8xf32>, vector<8x16xf32>, vector<136x16xf32> -> vector<136x16xf32>
    %24 = arith.addf %19, %23 : vector<136x16xf32>
    %c0_19 = arith.constant 0 : index
    %c0_20 = arith.constant 0 : index
    %25 = vector.load %arg5[%c0_19, %c0_20] : memref<1x16xf32, #tpu.memory_space<vmem>>, vector<1x16xf32>
    %26 = vector.broadcast %25 : vector<1x16xf32> to vector<136x16xf32>
    %27 = arith.addf %24, %26 : vector<136x16xf32>
    %cst_21 = arith.constant 0.000000e+00 : f32
    %28 = vector.broadcast %cst_21 : f32 to vector<136x16xf32>
    %29 = arith.maximumf %27, %28 : vector<136x16xf32>
    %c0_22 = arith.constant 0 : index
    %c0_23 = arith.constant 0 : index
    %30 = vector.load %arg12[%c0_22, %c0_23] : memref<136x16xf32, #tpu.memory_space<vmem>>, vector<136x16xf32>
    tpu.vector_store %arg12[%c0_22, %c0_23], %29 {strides = array<i32>} : memref<136x16xf32, #tpu.memory_space<vmem>>, vector<136x16xf32>,
    %c0_i32_24 = arith.constant 0 : i32
    %31 = arith.cmpi eq, %arg1, %c0_i32_24 : i32
    %32 = arith.extui %31 : i1 to i32
    %c0_i32_25 = arith.constant 0 : i32
    %33 = arith.cmpi ne, %32, %c0_i32_25 : i32
    scf.if %33 {
      %cst_60 = arith.constant 0.000000e+00 : f32
      %68 = vector.broadcast %cst_60 : f32 to vector<8x16xf32>
      %c0_61 = arith.constant 0 : index
      %c0_62 = arith.constant 0 : index
      %69 = vector.load %arg12[%c0_61, %c0_62] : memref<136x16xf32, #tpu.memory_space<vmem>>, vector<8x16xf32>
      tpu.vector_store %arg12[%c0_61, %c0_62], %68 {strides = array<i32>} : memref<136x16xf32, #tpu.memory_space<vmem>>, vector<8x16xf32>,
    } else {
    }
    %cst_26 = arith.constant 0.000000e+00 : f32
    %34 = vector.broadcast %cst_26 : f32 to vector<128x16xf32>
    %c4_27 = arith.constant 4 : index
    %c0_28 = arith.constant 0 : index
    %35 = vector.load %arg12[%c4_27, %c0_28] : memref<136x16xf32, #tpu.memory_space<vmem>>, vector<128x16xf32>
    %c0_29 = arith.constant 0 : index
    %c0_30 = arith.constant 0 : index
    %c0_31 = arith.constant 0 : index
    %36 = vector.load %arg6[%c0_29, %c0_30, %c0_31] : memref<3x16x16xf32, #tpu.memory_space<vmem>>, vector<1x16x16xf32>
    %37 = vector.shape_cast %36 : vector<1x16x16xf32> to vector<16x16xf32>
    %cst_32 = arith.constant dense<0.000000e+00> : vector<128x16xf32>
    %38 = tpu.matmul %35, %37, %cst_32 {dimension_numbers = #tpu.dot_dimension_numbers<[1], [0], [0], [1], [0, 0, 1, 1], [], []>} : vector<128x16xf32>, vector<16x16xf32>, vector<128x16xf32> -> vector<128x16xf32>
    %39 = arith.addf %34, %38 : vector<128x16xf32>
    %c6_33 = arith.constant 6 : index
    %c0_34 = arith.constant 0 : index
    %40 = vector.load %arg12[%c6_33, %c0_34] : memref<136x16xf32, #tpu.memory_space<vmem>>, vector<128x16xf32>
    %c1_35 = arith.constant 1 : index
    %c0_36 = arith.constant 0 : index
    %c0_37 = arith.constant 0 : index
    %41 = vector.load %arg6[%c1_35, %c0_36, %c0_37] : memref<3x16x16xf32, #tpu.memory_space<vmem>>, vector<1x16x16xf32>
    %42 = vector.shape_cast %41 : vector<1x16x16xf32> to vector<16x16xf32>
    %cst_38 = arith.constant dense<0.000000e+00> : vector<128x16xf32>
    %43 = tpu.matmul %40, %42, %cst_38 {dimension_numbers = #tpu.dot_dimension_numbers<[1], [0], [0], [1], [0, 0, 1, 1], [], []>} : vector<128x16xf32>, vector<16x16xf32>, vector<128x16xf32> -> vector<128x16xf32>
    %44 = arith.addf %39, %43 : vector<128x16xf32>
    %c8_39 = arith.constant 8 : index
    %c0_40 = arith.constant 0 : index
    %45 = vector.load %arg12[%c8_39, %c0_40] : memref<136x16xf32, #tpu.memory_space<vmem>>, vector<128x16xf32>
    %c2_41 = arith.constant 2 : index
    %c0_42 = arith.constant 0 : index
    %c0_43 = arith.constant 0 : index
    %46 = vector.load %arg6[%c2_41, %c0_42, %c0_43] : memref<3x16x16xf32, #tpu.memory_space<vmem>>, vector<1x16x16xf32>
    %47 = vector.shape_cast %46 : vector<1x16x16xf32> to vector<16x16xf32>
    %cst_44 = arith.constant dense<0.000000e+00> : vector<128x16xf32>
    %48 = tpu.matmul %45, %47, %cst_44 {dimension_numbers = #tpu.dot_dimension_numbers<[1], [0], [0], [1], [0, 0, 1, 1], [], []>} : vector<128x16xf32>, vector<16x16xf32>, vector<128x16xf32> -> vector<128x16xf32>
    %49 = arith.addf %44, %48 : vector<128x16xf32>
    %c0_45 = arith.constant 0 : index
    %c0_46 = arith.constant 0 : index
    %50 = vector.load %arg7[%c0_45, %c0_46] : memref<1x16xf32, #tpu.memory_space<vmem>>, vector<1x16xf32>
    %51 = vector.broadcast %50 : vector<1x16xf32> to vector<128x16xf32>
    %52 = arith.addf %49, %51 : vector<128x16xf32>
    %cst_47 = arith.constant 0.000000e+00 : f32
    %53 = vector.broadcast %cst_47 : f32 to vector<128x16xf32>
    %54 = arith.maximumf %52, %53 : vector<128x16xf32>
    %c0_48 = arith.constant 0 : index
    %c0_49 = arith.constant 0 : index
    %c0_50 = arith.constant 0 : index
    %55 = vector.load %arg3[%c0_48, %c0_49, %c0_50] : memref<1x128x8xf32, #tpu.memory_space<vmem>>, vector<1x128x8xf32>
    %56 = vector.shape_cast %55 : vector<1x128x8xf32> to vector<128x8xf32>
    %c0_51 = arith.constant 0 : index
    %c0_52 = arith.constant 0 : index
    %57 = vector.load %arg8[%c0_51, %c0_52] : memref<8x16xf32, #tpu.memory_space<vmem>>, vector<8x16xf32>
    %cst_53 = arith.constant dense<0.000000e+00> : vector<128x16xf32>
    %58 = tpu.matmul %56, %57, %cst_53 {dimension_numbers = #tpu.dot_dimension_numbers<[1], [0], [0], [1], [0, 0, 1, 1], [], []>} : vector<128x8xf32>, vector<8x16xf32>, vector<128x16xf32> -> vector<128x16xf32>
    %c0_54 = arith.constant 0 : index
    %c0_55 = arith.constant 0 : index
    %59 = vector.load %arg9[%c0_54, %c0_55] : memref<1x16xf32, #tpu.memory_space<vmem>>, vector<1x16xf32>
    %60 = vector.broadcast %59 : vector<1x16xf32> to vector<128x16xf32>
    %61 = arith.addf %58, %60 : vector<128x16xf32>
    %62 = arith.addf %54, %61 : vector<128x16xf32>
    %cst_56 = arith.constant 0.000000e+00 : f32
    %63 = vector.broadcast %cst_56 : f32 to vector<128x16xf32>
    %64 = arith.maximumf %62, %63 : vector<128x16xf32>
    %c0_57 = arith.constant 0 : index
    %c0_58 = arith.constant 0 : index
    %c0_59 = arith.constant 0 : index
    %65 = vector.load %arg10[%c0_57, %c0_58, %c0_59] : memref<1x128x16xf32, #tpu.memory_space<vmem>>, vector<1x128x16xf32>
    %66 = vector.shape_cast %65 : vector<1x128x16xf32> to vector<128x16xf32>
    %67 = vector.shape_cast %64 : vector<128x16xf32> to vector<1x128x16xf32>
    tpu.vector_store %arg10[%c0_57, %c0_58, %c0_59], %67 {strides = array<i32>} : memref<1x128x16xf32, #tpu.memory_space<vmem>>, vector<1x128x16xf32>,
    return
  }
  func.func @transform_0(%arg0: i32, %arg1: i32) -> (i32, i32, i32) {
    %c8_i32 = arith.constant 8 : i32
    %0 = arith.muli %arg1, %c8_i32 : i32
    %c1_i32 = arith.constant 1 : i32
    %1 = arith.subi %0, %c1_i32 : i32
    %c0_i32 = arith.constant 0 : i32
    %2 = arith.maxsi %1, %c0_i32 : i32
    %c0_i32_0 = arith.constant 0 : i32
    %c0_i32_1 = arith.constant 0 : i32
    return %arg0, %2, %c0_i32_0 : i32, i32, i32
  }
  func.func @transform_1(%arg0: i32, %arg1: i32) -> (i32, i32, i32) {
    %c0_i32 = arith.constant 0 : i32
    %c0_i32_0 = arith.constant 0 : i32
    return %arg0, %arg1, %c0_i32 : i32, i32, i32
  }
  func.func @transform_2(%arg0: i32, %arg1: i32) -> (i32, i32, i32) {
    %c0_i32 = arith.constant 0 : i32
    %c0_i32_0 = arith.constant 0 : i32
    %c0_i32_1 = arith.constant 0 : i32
    %c0_i32_2 = arith.constant 0 : i32
    return %c0_i32, %c0_i32_0, %c0_i32_1 : i32, i32, i32
  }
  func.func @transform_3(%arg0: i32, %arg1: i32) -> (i32, i32) {
    %c0_i32 = arith.constant 0 : i32
    %c0_i32_0 = arith.constant 0 : i32
    %c0_i32_1 = arith.constant 0 : i32
    return %c0_i32, %c0_i32_0 : i32, i32
  }
  func.func @transform_4(%arg0: i32, %arg1: i32) -> (i32, i32, i32) {
    %c0_i32 = arith.constant 0 : i32
    %c0_i32_0 = arith.constant 0 : i32
    %c0_i32_1 = arith.constant 0 : i32
    %c0_i32_2 = arith.constant 0 : i32
    return %c0_i32, %c0_i32_0, %c0_i32_1 : i32, i32, i32
  }
  func.func @transform_5(%arg0: i32, %arg1: i32) -> (i32, i32) {
    %c0_i32 = arith.constant 0 : i32
    %c0_i32_0 = arith.constant 0 : i32
    %c0_i32_1 = arith.constant 0 : i32
    return %c0_i32, %c0_i32_0 : i32, i32
  }
  func.func @transform_6(%arg0: i32, %arg1: i32) -> (i32, i32) {
    %c0_i32 = arith.constant 0 : i32
    %c0_i32_0 = arith.constant 0 : i32
    %c0_i32_1 = arith.constant 0 : i32
    return %c0_i32, %c0_i32_0 : i32, i32
  }
  func.func @transform_7(%arg0: i32, %arg1: i32) -> (i32, i32) {
    %c0_i32 = arith.constant 0 : i32
    %c0_i32_0 = arith.constant 0 : i32
    %c0_i32_1 = arith.constant 0 : i32
    return %c0_i32, %c0_i32_0 : i32, i32
  }
  func.func @transform_8(%arg0: i32, %arg1: i32) -> (i32, i32, i32) {
    %c0_i32 = arith.constant 0 : i32
    %c0_i32_0 = arith.constant 0 : i32
    return %arg0, %arg1, %c0_i32 : i32, i32, i32
  }
}

</mosaic_0001>

<bundles_post_ra>
// kernel: tpu_custom_call.1
= control target key start
LH: loop header
LB: loop body
LE: loop exit
PB: predicated region body
PF: predicated region fallthrough
CT: control target
= control target key end

     0   :  { %s1967_s27 = smov 0   ;;  %s1969_s28 = smov 0   ;;  %s2393_s0 = inlined_call_operand.vmem [shape: f32[2,256,8], index: 0, kind: input, shape index: {}]   ;;  %s2394_s1 = inlined_call_operand.vmem [shape: f32[2,256,8], index: 1, kind: input, shape index: {}]   ;;  %s2395_s2 = inlined_call_operand.vmem [shape: f32[3,8,16], index: 2, kind: input, shape index: {}]   ;;  %s2396_s3 = inlined_call_operand.vmem [shape: f32[1,16], index: 3, kind: input, shape index: {}]   ;;  %s2397_s4 = inlined_call_operand.vmem [shape: f32[3,16,16], index: 4, kind: input, shape index: {}]   ;;  %s2398_s5 = inlined_call_operand.vmem [shape: f32[1,16], index: 5, kind: input, shape index: {}]   ;;  %s2399_s6 = inlined_call_operand.vmem [shape: f32[8,16], index: 6, kind: input, shape index: {}]   ;;  %s2400_s7 = inlined_call_operand.vmem [shape: f32[1,16], index: 7, kind: input, shape index: {}]   ;;  %s2401_s8 = inlined_call_operand.vmem [shape: f32[2,256,16], index: 8, kind: output, shape index: {}]  }
   0x1   :  { %s1971_s29 = smov 0   ;;  %s1973_s30 = smov 0  }
   0x2   :  { %s1975_s9 = smov 0  }
   0x3 LB: > { %s27_s10 = sadd.s32 1, %s1910_s29  ;;  %s30_s11 = sadd.s32 1, %s1914_s30  ;;  %s1918_s9 = sphi %s1975_s9, %s18_s9   ;;  %s1914_s30 = sphi %s1973_s30, %s2407_s30   ;;  %s1910_s29 = sphi %s1971_s29, %s2406_s29   ;;  %s1906_s28 = sphi %s1969_s28, %s2405_s28   ;;  %s1902_s27 = sphi %s1967_s27, %s2404_s27  }
   0x4   : > { %p28_p0 = scmp.ge.s32.totalorder %s27_s10, 2  ;;  %p1693_p1 = scmp.ge.s32.totalorder %s1918_s9, 1 }
   0x5   : > { %p316_p2 = scmp.lt.s32.totalorder %s1918_s9, 5 }
   0x6   : > { %s2409_s10 = smov (%p28_p0, %s27_s10), 0  ;;  %s2411_s11 = smov (!%p28_p0, %s30_s11), %s1914_s30 }
   0x7   : > { %p317_p3 = pnand %p1693_p1, %p316_p2  ;;  %p32_p4 = scmp.ge.s32.totalorder %s2411_s11, 2 }
   0x8   : > { %s1694_s12 = sshll.u32 (!%p317_p3), %s1902_s27, 3  ;;  %p376_p5 = scmp.lt.s32.totalorder (!%p317_p3), %s1906_s28, 1 }
   0x9   : > { %s2413_s11 = smov (%p32_p4, %s2411_s11), 0  ;;  %320 = sbr.rel (%p317_p3) target bundleno = 751 (0x2ef), region = 52 }
   0xa   : > { %2402 = sst [smem:[#allocation4_spill]] %s2413_s11  ;;  %s1695_s13 = sadd.s32 (!%p317_p3), 4294967295, %s1694_s12 }
   0xb   : > { %s1699_s14 = sshll.u32 (!%p317_p3), %s1902_s27, 4  ;;  %p373_p6 = scmp.gt.s32.totalorder (!%p317_p3), %s1695_s13, 0 }
   0xc   : > { %p392_p7 = scmp.lt.s32.totalorder (!%p317_p3), %s1699_s14, 31  ;;  %p1705_p9 = scmp.le.s32.totalorder (!%p317_p3), %s1902_s27, 0 }
   0xe   : > { %s2415_s28 = smov (!%p376_p5, %s1906_s28), 1  ;;  %s2417_s13 = smov (!%p373_p6, %s1695_s13), 0 }
   0xf   : > { %s1696_s15 = sshll.u32 %s2417_s13, 1  ;;  %s1697_s16 = sshll.u32 %s2415_s28, 5 }
  0x10   : > { %p378_p8 = scmp.lt.s32.totalorder %s1696_s15, 31  ;;  %s2419_s14 = smov (!%p392_p7, %s1699_s14), 31 }
  0x11   : > { %s395_s17 = sadd.s32 %s1697_s16, %s2419_s14  ;;  %412 = sbr.rel (%p1705_p9) target bundleno = 25 (0x19), region = 56 }
  0x12   : > { %s2421_s15 = smov (!%p378_p8, %s1696_s15), 31  ;;  %s1701_s19 = sshll.u32 %s395_s17, 3 }
  0x13   : > { %s381_s18 = sadd.s32 %s1697_s16, %s2421_s15  ;;  %s2004_s23 = scalar_lea.vmem %s2394_s1, %s1701_s19 }
  0x14   : > { %s1698_s20 = sshll.u32 %s381_s18, 3  ;;  %s2012_s13 = scalar_lea.vmem %s2401_s8, %s1701_s19 }
  0x15   : > { %s383_s26 = scalar_lea.vmem %s2393_s0, %s1698_s20 }
  0x16   : > { %v413_v0 = vld [vmem:[%s383_s26] sm:$0xff]  ;;  %vm415_vm0 = vcmask 64512   ;;  %v414_v1 = vld [vmem:[%s383_s26 + $0x8] sm:$0xff] }
  0x17   : > { %416 = vst.msk [vmem:[#allocation2] sm:$0xff] %vm415_vm0, %v413_v0 }
  0x18   : > { %417 = vst.msk [vmem:[#allocation2 + $0x8] sm:$0xff] %vm415_vm0, %v414_v1 }
  0x19 PF: > { %p1706_p10 = scmp.ne.s32.totalorder %s1902_s27, 0 }
  0x1b   : > { %421 = sbr.rel (%p1706_p10) target bundleno = 35 (0x23), region = 60 }
  0x20   : > { %vm422_vm1 = vcmask 64512   ;;  %v1920_v2 = vmov 0.0  }
  0x21   : > { %423 = vst.msk [vmem:[#allocation2] sm:$0xff] %vm422_vm1, %v1920_v2 }
  0x22   : > { %424 = vst.msk [vmem:[#allocation2 + $0x8] sm:$0xff] %vm422_vm1, %v1920_v2 }
  0x23 PF: > { %v1707_v3 = vld [vmem:[%s2395_s2 + $0x8] sm:$0xff]  ;;  %v436_v4 = vld [vmem:[%s2004_s23 + $0x58] sm:$0xff]  ;;  %v437_v5 = vld [vmem:[%s2004_s23 + $0x60] sm:$0xff]  ;;  %vm441_vm2 = vcmask 64512   ;;  %vm926_vm3 = vcmask 130048  }
  0x24   : > { %1831 = vmatpush.msra.mxu2 %v1707_v3  ;;  %453 = vst.msk [vmem:[#allocation2 + $0x68] sm:$0xff] %vm441_vm2, %v436_v4  ;;  %v475_v6 = vld [vmem:[%s2395_s2] sm:$0xff]  ;;  %v438_v7 = vld [vmem:[%s2004_s23 + $0x68] sm:$0xff]  ;;  %v439_v8 = vld [vmem:[%s2004_s23 + $0x70] sm:$0xff]  ;;  %561 = vmatpush.msra.mxu0 %v1707_v3 }
  0x25   : > { %454 = vst.msk [vmem:[#allocation2 + $0x70] sm:$0xff] %vm441_vm2, %v437_v5  ;;  %v440_v9 = vld [vmem:[%s2004_s23 + $0x78] sm:$0xff]  ;;  %680 = vmatpush.msra.mxu1 %v475_v6  ;;  %v1742_v11 = vld [vmem:[%s2395_s2 + $0x10] sm:$0xff]  ;;  %v425_v16 = vld [vmem:[%s2004_s23] sm:$0xff] }
  0x26   : > { %1832 = vmatpush.msrb.mxu2 %v475_v6  ;;  %455 = vst.msk [vmem:[#allocation2 + $0x78] sm:$0xff] %vm441_vm2, %v438_v7  ;;  %v426_v20 = vld [vmem:[%s2004_s23 + $0x8] sm:$0xff]  ;;  %v427_v24 = vld [vmem:[%s2004_s23 + $0x10] sm:$0xff]  ;;  %v428_v28 = vld [vmem:[%s2004_s23 + $0x18] sm:$0xff] }
  0x27   : > { %456 = vst.msk [vmem:[#allocation2 + $0x80] sm:$0xff] %vm441_vm2, %v439_v8  ;;  %v429_v32 = vld [vmem:[%s2004_s23 + $0x20] sm:$0xff]  ;;  %v430_v36 = vld [vmem:[%s2004_s23 + $0x28] sm:$0xff]  ;;  %v431_v40 = vld [vmem:[%s2004_s23 + $0x30] sm:$0xff] }
  0x28   : > { %457 = vst.msk [vmem:[#allocation2 + $0x88] sm:$0xff] %vm441_vm2, %v440_v9  ;;  %v432_v44 = vld [vmem:[%s2004_s23 + $0x38] sm:$0xff]  ;;  %v433_v48 = vld [vmem:[%s2004_s23 + $0x40] sm:$0xff]  ;;  %v434_v52 = vld [vmem:[%s2004_s23 + $0x48] sm:$0xff] }
  0x29   : > { %v476_v17 = vld [vmem:[#allocation2 + $0x6] sm:$0xff]  ;;  %442 = vst.msk [vmem:[#allocation2 + $0x10] sm:$0xff] %vm441_vm2, %v425_v16  ;;  %v435_v56 = vld [vmem:[%s2004_s23 + $0x50] sm:$0xff] }
  0x2a   : > { %v458_v18 = vld [vmem:[#allocation2 + $0x4] sm:$0xff]  ;;  %1708 = vmatmul.msk.f32.vlgmr.msra.gmra.mxu0 %vm441_vm2, %v476_v17  ;;  %443 = vst.msk [vmem:[#allocation2 + $0x18] sm:$0xff] %vm441_vm2, %v426_v20 }
  0x2b   : > { %1725 = vmatmul.msk.f32.vlgmr.msra.gmra.mxu1 %vm441_vm2, %v458_v18  ;;  %444 = vst.msk [vmem:[#allocation2 + $0x20] sm:$0xff] %vm441_vm2, %v427_v24  ;;  %v733_v31 = vld [vmem:[#allocation2 + $0x8] sm:$0xff] }
  0x2c   : > { %v489_v10 = vld [vmem:[#allocation2 + $0x6e] sm:$0xff]  ;;  %445 = vst.msk [vmem:[#allocation2 + $0x28] sm:$0xff] %vm441_vm2, %v428_v28  ;;  %v2121_v28 = vld [vmem:[%s2396_s3] ss:$0 sm:$0xff] }
  0x2d   : > { %1721 = vmatmul.msk.f32.vlgmr.msra.gmra.mxu2 %vm441_vm2, %v489_v10  ;;  %v490_v12 = vld [vmem:[#allocation2 + $0x76] sm:$0xff]  ;;  %v471_v15 = vld [vmem:[#allocation2 + $0x6c] sm:$0xff]  ;;  %446 = vst.msk [vmem:[#allocation2 + $0x30] sm:$0xff] %vm441_vm2, %v429_v32 }
  0x2e   : > { %818 = vmatpush.msra.mxu2 %v1742_v11  ;;  %v491_v13 = vld [vmem:[#allocation2 + $0x7e] sm:$0xff]  ;;  %v472_v19 = vld [vmem:[#allocation2 + $0x74] sm:$0xff]  ;;  %447 = vst.msk [vmem:[#allocation2 + $0x38] sm:$0xff] %vm441_vm2, %v430_v36  ;;  %v745_v8 = vld [vmem:[#allocation2 + $0x68] sm:$0xff] }
  0x2f   : > { %v492_v14 = vld [vmem:[#allocation2 + $0x86] sm:$0xff]  ;;  %v473_v23 = vld [vmem:[#allocation2 + $0x7c] sm:$0xff]  ;;  %448 = vst.msk [vmem:[#allocation2 + $0x40] sm:$0xff] %vm441_vm2, %v431_v40 }
  0x30   : > { %v477_v21 = vld [vmem:[#allocation2 + $0xe] sm:$0xff]  ;;  %v474_v27 = vld [vmem:[#allocation2 + $0x84] sm:$0xff]  ;;  %449 = vst.msk [vmem:[#allocation2 + $0x48] sm:$0xff] %vm441_vm2, %v432_v44  ;;  %v747_v16 = vld [vmem:[#allocation2 + $0x78] sm:$0xff] }
  0x31   : > { %v459_v22 = vld [vmem:[#allocation2 + $0xc] sm:$0xff]  ;;  %v478_v25 = vld [vmem:[#allocation2 + $0x16] sm:$0xff]  ;;  %450 = vst.msk [vmem:[#allocation2 + $0x50] sm:$0xff] %vm441_vm2, %v433_v48 }
  0x32   : > { %1709 = vmatmul.msk.f32.gmra.mxu0 %vm441_vm2, %v477_v21  ;;  %v460_v26 = vld [vmem:[#allocation2 + $0x14] sm:$0xff]  ;;  %v479_v29 = vld [vmem:[#allocation2 + $0x1e] sm:$0xff]  ;;  %451 = vst.msk [vmem:[#allocation2 + $0x58] sm:$0xff] %vm441_vm2, %v434_v52 }
  0x33   : > { %1726 = vmatmul.msk.f32.gmra.mxu1 %vm441_vm2, %v459_v22  ;;  %v461_v30 = vld [vmem:[#allocation2 + $0x1c] sm:$0xff]  ;;  %v480_v33 = vld [vmem:[#allocation2 + $0x26] sm:$0xff]  ;;  %v734_v35 = vld [vmem:[#allocation2 + $0x10] sm:$0xff]  ;;  %452 = vst.msk [vmem:[#allocation2 + $0x60] sm:$0xff] %vm441_vm2, %v435_v56 }
  0x34   : > { %v462_v34 = vld [vmem:[#allocation2 + $0x24] sm:$0xff]  ;;  %v481_v37 = vld [vmem:[#allocation2 + $0x2e] sm:$0xff]  ;;  %v735_v39 = vld [vmem:[#allocation2 + $0x18] sm:$0xff] }
  0x35   : > { %1722 = vmatmul.msk.f32.gmra.mxu2 %vm441_vm2, %v490_v12  ;;  %v463_v38 = vld [vmem:[#allocation2 + $0x2c] sm:$0xff]  ;;  %v482_v41 = vld [vmem:[#allocation2 + $0x36] sm:$0xff]  ;;  %v736_v43 = vld [vmem:[#allocation2 + $0x20] sm:$0xff] }
  0x36   : > { %v464_v42 = vld [vmem:[#allocation2 + $0x34] sm:$0xff]  ;;  %v483_v45 = vld [vmem:[#allocation2 + $0x3e] sm:$0xff]  ;;  %v737_v47 = vld [vmem:[#allocation2 + $0x28] sm:$0xff] }
  0x37   : > { %v465_v46 = vld [vmem:[#allocation2 + $0x3c] sm:$0xff]  ;;  %v484_v49 = vld [vmem:[#allocation2 + $0x46] sm:$0xff]  ;;  %v738_v51 = vld [vmem:[#allocation2 + $0x30] sm:$0xff] }
  0x38   : > { %v466_v50 = vld [vmem:[#allocation2 + $0x44] sm:$0xff]  ;;  %v485_v53 = vld [vmem:[#allocation2 + $0x4e] sm:$0xff]  ;;  %v739_v55 = vld [vmem:[#allocation2 + $0x38] sm:$0xff] }
  0x39   : > { %v467_v54 = vld [vmem:[#allocation2 + $0x4c] sm:$0xff]  ;;  %v486_v57 = vld [vmem:[#allocation2 + $0x56] sm:$0xff]  ;;  %v740_v59 = vld [vmem:[#allocation2 + $0x40] sm:$0xff] }
  0x3a   : > { %1710 = vmatmul.msk.f32.gmra.mxu0 %vm441_vm2, %v478_v25  ;;  %v468_v58 = vld [vmem:[#allocation2 + $0x54] sm:$0xff]  ;;  %v487_v60 = vld [vmem:[#allocation2 + $0x5e] sm:$0xff]  ;;  %v741_v62 = vld [vmem:[#allocation2 + $0x48] sm:$0xff] }
  0x3b   : > { %1727 = vmatmul.msk.f32.gmra.mxu1 %vm441_vm2, %v460_v26  ;;  %v469_v61 = vld [vmem:[#allocation2 + $0x5c] sm:$0xff]  ;;  %v488_v0 = vld [vmem:[#allocation2 + $0x66] sm:$0xff]  ;;  %v742_v2 = vld [vmem:[#allocation2 + $0x50] sm:$0xff] }
  0x3c   : > { %v470_v1 = vld [vmem:[#allocation2 + $0x64] sm:$0xff]  ;;  %v743_v4 = vld [vmem:[#allocation2 + $0x58] sm:$0xff]  ;;  %v746_v12 = vld [vmem:[#allocation2 + $0x70] sm:$0xff] }
  0x3d   : > { %1723 = vmatmul.msk.f32.gmra.mxu2 %vm441_vm2, %v491_v13  ;;  %v744_v6 = vld [vmem:[#allocation2 + $0x60] sm:$0xff]  ;;  %v749_v26 = vld [vmem:[#allocation2 + $0x88] sm:$0xff] }
  0x3e   : > { %v748_v21 = vld [vmem:[#allocation2 + $0x80] sm:$0xff] }
  0x42   : > { %1711 = vmatmul.msk.f32.gmra.mxu0 %vm441_vm2, %v479_v29 }
  0x43   : > { %1728 = vmatmul.msk.f32.gmra.mxu1 %vm441_vm2, %v461_v30 }
  0x45   : > { %1724 = vmatmul.msk.f32.gmra.mxu2 %vm441_vm2, %v492_v14 }
  0x4a   : > { %1712 = vmatmul.msk.f32.gmra.mxu0 %vm441_vm2, %v480_v33 }
  0x4b   : > { %1729 = vmatmul.msk.f32.gmra.mxu1 %vm441_vm2, %v462_v34 }
  0x4d   : > { %1738 = vmatmul.msk.f32.vlgmr.msrb.gmra.mxu2 %vm441_vm2, %v471_v15 }
  0x52   : > { %1713 = vmatmul.msk.f32.gmra.mxu0 %vm441_vm2, %v481_v37 }
  0x53   : > { %1730 = vmatmul.msk.f32.gmra.mxu1 %vm441_vm2, %v463_v38 }
  0x55   : > { %1739 = vmatmul.msk.f32.gmra.mxu2 %vm441_vm2, %v472_v19 }
  0x5a   : > { %1714 = vmatmul.msk.f32.gmra.mxu0 %vm441_vm2, %v482_v41 }
  0x5b   : > { %1731 = vmatmul.msk.f32.gmra.mxu1 %vm441_vm2, %v464_v42 }
  0x5d   : > { %1740 = vmatmul.msk.f32.gmra.mxu2 %vm441_vm2, %v473_v23 }
  0x62   : > { %1715 = vmatmul.msk.f32.gmra.mxu0 %vm441_vm2, %v483_v45 }
  0x63   : > { %1732 = vmatmul.msk.f32.gmra.mxu1 %vm441_vm2, %v465_v46 }
  0x65   : > { %1741 = vmatmul.msk.f32.gmra.mxu2 %vm441_vm2, %v474_v27 }
  0x6a   : > { %1716 = vmatmul.msk.f32.gmra.mxu0 %vm441_vm2, %v484_v49 }
  0x6b   : > { %1733 = vmatmul.msk.f32.gmra.mxu1 %vm441_vm2, %v466_v50 }
  0x6d   : > { %1743 = vmatmul.msk.f32.vlgmr.msra.gmra.mxu2 %vm441_vm2, %v733_v31 }
  0x72   : > { %1717 = vmatmul.msk.f32.gmra.mxu0 %vm441_vm2, %v485_v53 }
  0x73   : > { %1734 = vmatmul.msk.f32.gmra.mxu1 %vm441_vm2, %v467_v54 }
  0x75   : > { %1744 = vmatmul.msk.f32.gmra.mxu2 %vm441_vm2, %v734_v35 }
  0x7a   : > { %1718 = vmatmul.msk.f32.gmra.mxu0 %vm441_vm2, %v486_v57 }
  0x7b   : > { %1735 = vmatmul.msk.f32.gmra.mxu1 %vm441_vm2, %v468_v58 }
  0x7d   : > { %1745 = vmatmul.msk.f32.gmra.mxu2 %vm441_vm2, %v735_v39 }
  0x82   : > { %1719 = vmatmul.msk.f32.gmra.mxu0 %vm441_vm2, %v487_v60 }
  0x83   : > { %1736 = vmatmul.msk.f32.gmra.mxu1 %vm441_vm2, %v469_v61 }
  0x85   : > { %1746 = vmatmul.msk.f32.gmra.mxu2 %vm441_vm2, %v736_v43 }
  0x8a   : > { %1720 = vmatmul.msk.f32.gmra.mxu0 %vm441_vm2, %v488_v0 }
  0x8b   : > { %1737 = vmatmul.msk.f32.gmra.mxu1 %vm441_vm2, %v470_v1 }
  0x8d   : > { %1747 = vmatmul.msk.f32.gmra.mxu2 %vm441_vm2, %v737_v47 }
  0x95   : > { %1748 = vmatmul.msk.f32.gmra.mxu2 %vm441_vm2, %v738_v51 }
  0x9d   : > { %1749 = vmatmul.msk.f32.gmra.mxu2 %vm441_vm2, %v739_v55 }
  0xa5   : > { %1750 = vmatmul.msk.f32.gmra.mxu2 %vm441_vm2, %v740_v59 }
  0xa7   : > { %v563_v11 = vpop.f32.mrf.mxu0 }
  0xa8   : > { %v682_v13 = vpop.f32.mrf.mxu1 }
  0xa9   : > { %v683_v27 = vadd.f32 %v682_v13, %v563_v11 }
  0xad   : > { %1751 = vmatmul.msk.f32.gmra.mxu2 %vm441_vm2, %v741_v62 }
  0xaf   : > { %v566_v17 = vpop.f32.mrf.mxu0 }
  0xb0   : > { %v602_v63 = vpop.f32.mrf.mxu2  ;;  %v685_v18 = vpop.f32.mrf.mxu1 }
  0xb1   : > { %v686_v35 = vadd.f32 %v685_v18, %v566_v17 }
  0xb5   : > { %1752 = vmatmul.msk.f32.gmra.mxu2 %vm441_vm2, %v742_v2 }
  0xb7   : > { %v569_v22 = vpop.f32.mrf.mxu0 }
  0xb8   : > { %v605_v3 = vpop.f32.mrf.mxu2  ;;  %v688_v23 = vpop.f32.mrf.mxu1 }
  0xb9   : > { %v689_v42 = vadd.f32 %v688_v23, %v569_v22 }
  0xbd   : > { %1753 = vmatmul.msk.f32.gmra.mxu2 %vm441_vm2, %v743_v4 }
  0xbf   : > { %v572_v29 = vpop.f32.mrf.mxu0 }
  0xc0   : > { %v608_v5 = vpop.f32.mrf.mxu2  ;;  %v691_v31 = vpop.f32.mrf.mxu1 }
  0xc1   : > { %v692_v49 = vadd.f32 %v691_v31, %v572_v29 }
  0xc5   : > { %1754 = vmatmul.msk.f32.gmra.mxu2 %vm441_vm2, %v744_v6 }
  0xc7   : > { %v575_v38 = vpop.f32.mrf.mxu0 }
  0xc8   : > { %v611_v7 = vpop.f32.mrf.mxu2  ;;  %v694_v39 = vpop.f32.mrf.mxu1 }
  0xc9   : > { %v695_v54 = vadd.f32 %v694_v39, %v575_v38 }
  0xcd   : > { %1755 = vmatmul.msk.f32.gmra.mxu2 %vm441_vm2, %v745_v8 }
  0xcf   : > { %v578_v46 = vpop.f32.mrf.mxu0 }
  0xd0   : > { %v721_v9 = vpop.f32.mrf.mxu2  ;;  %v697_v47 = vpop.f32.mrf.mxu1 }
  0xd1   : > { %v2106_v10 = vadd.f32 %v721_v9, %v602_v63  ;;  %v698_v61 = vadd.f32 %v697_v47, %v578_v46 }
  0xd5   : > { %1756 = vmatmul.msk.f32.gmra.mxu2 %vm441_vm2, %v746_v12 }
  0xd7   : > { %v581_v55 = vpop.f32.mrf.mxu0 }
  0xd8   : > { %v724_v14 = vpop.f32.mrf.mxu2  ;;  %v700_v56 = vpop.f32.mrf.mxu1 }
  0xd9   : > { %v2109_v15 = vadd.f32 %v724_v14, %v605_v3  ;;  %v701_v4 = vadd.f32 %v700_v56, %v581_v55 }
  0xdd   : > { %1757 = vmatmul.msk.f32.gmra.mxu2 %vm441_vm2, %v747_v16 }
  0xdf   : > { %v584_v62 = vpop.f32.mrf.mxu0 }
  0xe0   : > { %v727_v19 = vpop.f32.mrf.mxu2  ;;  %v703_v0 = vpop.f32.mrf.mxu1 }
  0xe1   : > { %v2112_v20 = vadd.f32 %v727_v19, %v608_v5  ;;  %v704_v12 = vadd.f32 %v703_v0, %v584_v62 }
  0xe5   : > { %1758 = vmatmul.msk.f32.gmra.mxu2 %vm441_vm2, %v748_v21 }
  0xe8   : > { %v730_v24 = vpop.f32.mrf.mxu2  ;;  %v706_v8 = vpop.f32.mrf.mxu1 }
  0xe9   : > { %v2115_v25 = vadd.f32 %v730_v24, %v611_v7  ;;  %v587_v7 = vpop.f32.mrf.mxu0 }
  0xea   : > { %v707_v21 = vadd.f32 %v706_v8, %v587_v7 }
  0xed   : > { %1759 = vmatmul.msk.f32.gmra.mxu2 %vm441_vm2, %v749_v26 }
  0xf0   : > { %v820_v30 = vpop.f32.mrf.mxu2  ;;  %v709_v18 = vpop.f32.mrf.mxu1 }
  0xf1   : > { %v871_v32 = vadd.f32 %v820_v30, %v683_v27  ;;  %v590_v17 = vpop.f32.mrf.mxu0 }
  0xf2   : > { %v710_v27 = vadd.f32 %v709_v18, %v590_v17 }
  0xf3   : > { %v892_v33 = vadd.f32 %v2121_v28, %v871_v32 }
  0xf5   : > { %v909_v34 = vmax.f32 %v892_v33, 0.0 }
  0xf7   : > { %927 = vst.msk [vmem:[#allocation3] sm:$0xff] %vm926_vm3, %v909_v34 }
  0xf8   : > { %v823_v36 = vpop.f32.mrf.mxu2  ;;  %v712_v30 = vpop.f32.mrf.mxu1 }
  0xf9   : > { %v872_v37 = vadd.f32 %v823_v36, %v686_v35  ;;  %v593_v29 = vpop.f32.mrf.mxu0 }
  0xfa   : > { %v713_v35 = vadd.f32 %v712_v30, %v593_v29 }
  0xfb   : > { %v893_v40 = vadd.f32 %v2121_v28, %v872_v37 }
  0xfd   : > { %v910_v41 = vmax.f32 %v893_v40, 0.0 }
  0xff   : > { %928 = vst.msk [vmem:[#allocation3 + $0x8] sm:$0xff] %vm926_vm3, %v910_v41 }
 0x100   : > { %v826_v43 = vpop.f32.mrf.mxu2  ;;  %v715_v38 = vpop.f32.mrf.mxu1 }
 0x101   : > { %v873_v44 = vadd.f32 %v826_v43, %v689_v42  ;;  %v596_v36 = vpop.f32.mrf.mxu0 }
 0x102   : > { %v716_v42 = vadd.f32 %v715_v38, %v596_v36 }
 0x103   : > { %v894_v45 = vadd.f32 %v2121_v28, %v873_v44 }
 0x105   : > { %v911_v48 = vmax.f32 %v894_v45, 0.0 }
 0x107   : > { %929 = vst.msk [vmem:[#allocation3 + $0x10] sm:$0xff] %vm926_vm3, %v911_v48 }
 0x108   : > { %v829_v50 = vpop.f32.mrf.mxu2  ;;  %v718_v46 = vpop.f32.mrf.mxu1 }
 0x109   : > { %v874_v51 = vadd.f32 %v829_v50, %v692_v49  ;;  %v599_v45 = vpop.f32.mrf.mxu0 }
 0x10a   : > { %v719_v49 = vadd.f32 %v718_v46, %v599_v45 }
 0x10b   : > { %v895_v52 = vadd.f32 %v2121_v28, %v874_v51 }
 0x10d   : > { %v912_v53 = vmax.f32 %v895_v52, 0.0 }
 0x10f   : > { %930 = vst.msk [vmem:[#allocation3 + $0x18] sm:$0xff] %vm926_vm3, %v912_v53 }
 0x110   : > { %v832_v57 = vpop.f32.mrf.mxu2 }
 0x111   : > { %v875_v58 = vadd.f32 %v832_v57, %v695_v54 }
 0x113   : > { %v896_v59 = vadd.f32 %v2121_v28, %v875_v58 }
 0x115   : > { %v913_v60 = vmax.f32 %v896_v59, 0.0 }
 0x117   : > { %931 = vst.msk [vmem:[#allocation3 + $0x20] sm:$0xff] %vm926_vm3, %v913_v60 }
 0x118   : > { %v835_v63 = vpop.f32.mrf.mxu2 }
 0x119   : > { %v876_v1 = vadd.f32 %v835_v63, %v698_v61 }
 0x11b   : > { %v897_v2 = vadd.f32 %v2121_v28, %v876_v1 }
 0x11d   : > { %v914_v3 = vmax.f32 %v897_v2, 0.0 }
 0x11f   : > { %932 = vst.msk [vmem:[#allocation3 + $0x28] sm:$0xff] %vm926_vm3, %v914_v3 }
 0x120   : > { %v838_v5 = vpop.f32.mrf.mxu2 }
 0x121   : > { %v877_v6 = vadd.f32 %v838_v5, %v701_v4 }
 0x123   : > { %v898_v9 = vadd.f32 %v2121_v28, %v877_v6 }
 0x125   : > { %v915_v11 = vmax.f32 %v898_v9, 0.0 }
 0x127   : > { %933 = vst.msk [vmem:[#allocation3 + $0x30] sm:$0xff] %vm926_vm3, %v915_v11 }
 0x128   : > { %v841_v13 = vpop.f32.mrf.mxu2 }
 0x129   : > { %v878_v14 = vadd.f32 %v841_v13, %v704_v12 }
 0x12b   : > { %v899_v16 = vadd.f32 %v2121_v28, %v878_v14 }
 0x12d   : > { %v916_v19 = vmax.f32 %v899_v16, 0.0 }
 0x12f   : > { %934 = vst.msk [vmem:[#allocation3 + $0x38] sm:$0xff] %vm926_vm3, %v916_v19 }
 0x130   : > { %v844_v22 = vpop.f32.mrf.mxu2 }
 0x131   : > { %v879_v23 = vadd.f32 %v844_v22, %v707_v21 }
 0x133   : > { %v900_v24 = vadd.f32 %v2121_v28, %v879_v23 }
 0x135   : > { %v917_v26 = vmax.f32 %v900_v24, 0.0 }
 0x137   : > { %935 = vst.msk [vmem:[#allocation3 + $0x40] sm:$0xff] %vm926_vm3, %v917_v26 }
 0x138   : > { %v847_v31 = vpop.f32.mrf.mxu2 }
 0x139   : > { %v880_v32 = vadd.f32 %v847_v31, %v710_v27 }
 0x13b   : > { %v901_v33 = vadd.f32 %v2121_v28, %v880_v32 }
 0x13d   : > { %v918_v34 = vmax.f32 %v901_v33, 0.0 }
 0x13f   : > { %936 = vst.msk [vmem:[#allocation3 + $0x48] sm:$0xff] %vm926_vm3, %v918_v34 }
 0x140   : > { %v850_v37 = vpop.f32.mrf.mxu2 }
 0x141   : > { %v881_v39 = vadd.f32 %v850_v37, %v713_v35 }
 0x143   : > { %v902_v40 = vadd.f32 %v2121_v28, %v881_v39 }
 0x145   : > { %v919_v41 = vmax.f32 %v902_v40, 0.0 }
 0x147   : > { %937 = vst.msk [vmem:[#allocation3 + $0x50] sm:$0xff] %vm926_vm3, %v919_v41 }
 0x148   : > { %v853_v43 = vpop.f32.mrf.mxu2 }
 0x149   : > { %v882_v44 = vadd.f32 %v853_v43, %v716_v42 }
 0x14b   : > { %v903_v47 = vadd.f32 %v2121_v28, %v882_v44 }
 0x14d   : > { %v920_v48 = vmax.f32 %v903_v47, 0.0 }
 0x14f   : > { %938 = vst.msk [vmem:[#allocation3 + $0x58] sm:$0xff] %vm926_vm3, %v920_v48 }
 0x150   : > { %v856_v50 = vpop.f32.mrf.mxu2 }
 0x151   : > { %v883_v51 = vadd.f32 %v856_v50, %v719_v49 }
 0x153   : > { %v904_v52 = vadd.f32 %v2121_v28, %v883_v51 }
 0x155   : > { %v921_v53 = vmax.f32 %v904_v52, 0.0 }
 0x157   : > { %939 = vst.msk [vmem:[#allocation3 + $0x60] sm:$0xff] %vm926_vm3, %v921_v53 }
 0x158   : > { %v859_v54 = vpop.f32.mrf.mxu2 }
 0x159   : > { %v884_v55 = vadd.f32 %v859_v54, %v2106_v10 }
 0x15b   : > { %v905_v56 = vadd.f32 %v2121_v28, %v884_v55 }
 0x15d   : > { %v922_v57 = vmax.f32 %v905_v56, 0.0 }
 0x15f   : > { %940 = vst.msk [vmem:[#allocation3 + $0x68] sm:$0xff] %vm926_vm3, %v922_v57 }
 0x160   : > { %v862_v58 = vpop.f32.mrf.mxu2 }
 0x161   : > { %v885_v59 = vadd.f32 %v862_v58, %v2109_v15 }
 0x163   : > { %v906_v60 = vadd.f32 %v2121_v28, %v885_v59 }
 0x165   : > { %v923_v61 = vmax.f32 %v906_v60, 0.0 }
 0x167   : > { %941 = vst.msk [vmem:[#allocation3 + $0x70] sm:$0xff] %vm926_vm3, %v923_v61 }
 0x168   : > { %v865_v62 = vpop.f32.mrf.mxu2 }
 0x169   : > { %v886_v63 = vadd.f32 %v865_v62, %v2112_v20 }
 0x16b   : > { %v907_v0 = vadd.f32 %v2121_v28, %v886_v63 }
 0x16d   : > { %v924_v1 = vmax.f32 %v907_v0, 0.0 }
 0x16f   : > { %942 = vst.msk [vmem:[#allocation3 + $0x78] sm:$0xff] %vm926_vm3, %v924_v1 }
 0x170   : > { %v868_v10 = vpop.f32.mrf.mxu2 }
 0x171   : > { %v887_v2 = vadd.f32 %v868_v10, %v2115_v25 }
 0x173   : > { %v908_v3 = vadd.f32 %v2121_v28, %v887_v2  ;;  %946 = sbr.rel (%p1706_p10) target bundleno = 378 (0x17a), region = 64 }
 0x175   : > { %v925_v4 = vmax.f32 %v908_v3, 0.0 }
 0x177   : > { %943 = vst.msk [vmem:[#allocation3 + $0x80] sm:$0xff] %vm926_vm3, %v925_v4 }
 0x178   : > { %v1921_v15 = vmov 0.0  }
 0x179   : > { %947 = vst.msk [vmem:[#allocation3] sm:$0xff] %vm926_vm3, %v1921_v15 }
 0x17a PF: > { %v1762_v20 = vld [vmem:[%s2397_s4 + $0x18] sm:$0xff]  ;;  %v1761_v25 = vld [vmem:[%s2397_s4 + $0x10] sm:$0xff]  ;;  %v965_v5 = vld [vmem:[%s2397_s4 + $0x8] sm:$0xff] }
 0x17b   : > { %1833 = vmatpush.msra.mxu3 %v1762_v20  ;;  %v969_v28 = vld [vmem:[#allocation3 + $0x1e] sm:$0xff]  ;;  %1047 = vmatpush.msrb.mxu2 %v1762_v20  ;;  %v970_v6 = vld [vmem:[#allocation3 + $0x26] sm:$0xff]  ;;  %v971_v7 = vld [vmem:[#allocation3 + $0x2e] sm:$0xff] }
 0x17c   : > { %v964_v8 = vld [vmem:[%s2397_s4] sm:$0xff]  ;;  %v973_v11 = vld [vmem:[#allocation3 + $0x3e] sm:$0xff]  ;;  %v974_v12 = vld [vmem:[#allocation3 + $0x46] sm:$0xff] }
 0x17d   : > { %1834 = vmatpush.msra.mxu3 %v1761_v25  ;;  %1048 = vmatpush.msrb.mxu2 %v1761_v25  ;;  %v972_v9 = vld [vmem:[#allocation3 + $0x36] sm:$0xff]  ;;  %v975_v13 = vld [vmem:[#allocation3 + $0x4e] sm:$0xff]  ;;  %v977_v16 = vld [vmem:[#allocation3 + $0x5e] sm:$0xff] }
 0x17e   : > { %1766 = vmatmul.msk.f32.vlgmr.msra.gmra.mxu3 %vm926_vm3, %v969_v28  ;;  %v976_v14 = vld [vmem:[#allocation3 + $0x56] sm:$0xff]  ;;  %v978_v18 = vld [vmem:[#allocation3 + $0x66] sm:$0xff]  ;;  %v967_v22 = vld [vmem:[#allocation3 + $0xe] sm:$0xff] }
 0x17f   : > { %1160 = vmatpush.msrb.mxu3 %v965_v5  ;;  %v1796_v19 = vld [vmem:[%s2397_s4 + $0x28] sm:$0xff]  ;;  %v1795_v21 = vld [vmem:[%s2397_s4 + $0x20] sm:$0xff]  ;;  %v1211_v24 = vld [vmem:[#allocation3 + $0x8] sm:$0xff] }
 0x180   : > { %v966_v17 = vld [vmem:[#allocation3 + $0x6] sm:$0xff]  ;;  %1292 = vmatpush.msrb.mxu0 %v1796_v19  ;;  %v979_v23 = vld [vmem:[#allocation3 + $0x6e] sm:$0xff]  ;;  %v968_v29 = vld [vmem:[#allocation3 + $0x16] sm:$0xff] }
 0x181   : > { %1161 = vmatpush.msrb.mxu3 %v964_v8  ;;  %1763 = vmatmul.msk.f32.vlgmr.msrb.gmra.mxu2 %vm926_vm3, %v966_v17  ;;  %v1411_v26 = vld [vmem:[%s2399_s6] sm:$0xff]  ;;  %v1396_v32 = vld [vmem:[%s2004_s23 + $0x8] sm:$0xff]  ;;  %v1397_v35 = vld [vmem:[%s2004_s23 + $0x10] sm:$0xff] }
 0x182   : > { %1293 = vmatpush.msrb.mxu0 %v1795_v21  ;;  %v1395_v27 = vld [vmem:[%s2004_s23] sm:$0xff]  ;;  %1479 = vmatpush.msrb.mxu1 %v1411_v26  ;;  %v981_v33 = vld [vmem:[#allocation3 + $0x7e] sm:$0xff]  ;;  %v1398_v38 = vld [vmem:[%s2004_s23 + $0x18] sm:$0xff] }
 0x183   : > { %1797 = vmatmul.msk.f32.vlgmr.msrb.gmra.mxu0 %vm926_vm3, %v1211_v24  ;;  %1813 = vmatmul.msk.f32.vlgmr.msrb.gmra.mxu1 %vm441_vm2, %v1395_v27  ;;  %v980_v30 = vld [vmem:[#allocation3 + $0x76] sm:$0xff]  ;;  %v948_v36 = vld [vmem:[#allocation3 + $0x4] sm:$0xff]  ;;  %v949_v39 = vld [vmem:[#allocation3 + $0xc] sm:$0xff] }
 0x184   : > { %v1212_v31 = vld [vmem:[#allocation3 + $0x10] sm:$0xff]  ;;  %v1213_v34 = vld [vmem:[#allocation3 + $0x18] sm:$0xff]  ;;  %v1214_v37 = vld [vmem:[#allocation3 + $0x20] sm:$0xff] }
 0x185   : > { %v1215_v40 = vld [vmem:[#allocation3 + $0x28] sm:$0xff]  ;;  %v1399_v41 = vld [vmem:[%s2004_s23 + $0x20] sm:$0xff]  ;;  %v1400_v44 = vld [vmem:[%s2004_s23 + $0x28] sm:$0xff] }
 0x186   : > { %1767 = vmatmul.msk.f32.gmra.mxu3 %vm926_vm3, %v970_v6  ;;  %v950_v42 = vld [vmem:[#allocation3 + $0x14] sm:$0xff]  ;;  %v951_v45 = vld [vmem:[#allocation3 + $0x1c] sm:$0xff]  ;;  %v952_v49 = vld [vmem:[#allocation3 + $0x24] sm:$0xff] }
 0x187   : > { %v1216_v43 = vld [vmem:[#allocation3 + $0x30] sm:$0xff]  ;;  %v1217_v46 = vld [vmem:[#allocation3 + $0x38] sm:$0xff]  ;;  %v1401_v48 = vld [vmem:[%s2004_s23 + $0x30] sm:$0xff] }
 0x188   : > { %v1218_v50 = vld [vmem:[#allocation3 + $0x40] sm:$0xff]  ;;  %v1402_v52 = vld [vmem:[%s2004_s23 + $0x38] sm:$0xff]  ;;  %v1403_v56 = vld [vmem:[%s2004_s23 + $0x40] sm:$0xff] }
 0x189   : > { %1764 = vmatmul.msk.f32.gmra.mxu2 %vm926_vm3, %v967_v22  ;;  %v953_v53 = vld [vmem:[#allocation3 + $0x2c] sm:$0xff]  ;;  %v954_v57 = vld [vmem:[#allocation3 + $0x34] sm:$0xff]  ;;  %v955_v61 = vld [vmem:[#allocation3 + $0x3c] sm:$0xff] }
 0x18a   : > { %v1219_v54 = vld [vmem:[#allocation3 + $0x48] sm:$0xff]  ;;  %v1220_v58 = vld [vmem:[#allocation3 + $0x50] sm:$0xff]  ;;  %v1404_v60 = vld [vmem:[%s2004_s23 + $0x48] sm:$0xff] }
 0x18b   : > { %1798 = vmatmul.msk.f32.gmra.mxu0 %vm926_vm3, %v1212_v31  ;;  %1814 = vmatmul.msk.f32.gmra.mxu1 %vm441_vm2, %v1396_v32  ;;  %v1221_v62 = vld [vmem:[#allocation3 + $0x58] sm:$0xff]  ;;  %v1405_v0 = vld [vmem:[%s2004_s23 + $0x50] sm:$0xff]  ;;  %v1406_v3 = vld [vmem:[%s2004_s23 + $0x58] sm:$0xff] }
 0x18c   : > { %v956_v1 = vld [vmem:[#allocation3 + $0x44] sm:$0xff]  ;;  %v957_v4 = vld [vmem:[#allocation3 + $0x4c] sm:$0xff]  ;;  %v958_v28 = vld [vmem:[#allocation3 + $0x54] sm:$0xff] }
 0x18d   : > { %v1222_v10 = vld [vmem:[#allocation3 + $0x60] sm:$0xff]  ;;  %v1223_v15 = vld [vmem:[#allocation3 + $0x68] sm:$0xff]  ;;  %v1407_v25 = vld [vmem:[%s2004_s23 + $0x60] sm:$0xff] }
 0x18e   : > { %1768 = vmatmul.msk.f32.gmra.mxu3 %vm926_vm3, %v971_v7  ;;  %v1224_v5 = vld [vmem:[#allocation3 + $0x70] sm:$0xff]  ;;  %v1408_v7 = vld [vmem:[%s2004_s23 + $0x68] sm:$0xff]  ;;  %v1410_v17 = vld [vmem:[%s2004_s23 + $0x78] sm:$0xff] }
 0x18f   : > { %v959_v8 = vld [vmem:[#allocation3 + $0x5c] sm:$0xff] }
 0x191   : > { %1765 = vmatmul.msk.f32.gmra.mxu2 %vm926_vm3, %v968_v29  ;;  %v963_v29 = vld [vmem:[#allocation3 + $0x7c] sm:$0xff] }
 0x193   : > { %1799 = vmatmul.msk.f32.gmra.mxu0 %vm926_vm3, %v1213_v34  ;;  %1815 = vmatmul.msk.f32.gmra.mxu1 %vm441_vm2, %v1397_v35 }
 0x196   : > { %1769 = vmatmul.msk.f32.gmra.mxu3 %vm926_vm3, %v972_v9  ;;  %v1225_v9 = vld [vmem:[#allocation3 + $0x78] sm:$0xff] }
 0x19b   : > { %1800 = vmatmul.msk.f32.gmra.mxu0 %vm926_vm3, %v1214_v37  ;;  %1816 = vmatmul.msk.f32.gmra.mxu1 %vm441_vm2, %v1398_v38  ;;  %v2294_v37 = vld [vmem:[%s2398_s5] ss:$0 sm:$0xff] }
 0x19c   : > { %v2299_v38 = vld [vmem:[%s2400_s7] ss:$0 sm:$0xff] }
 0x19e   : > { %1770 = vmatmul.msk.f32.gmra.mxu3 %vm926_vm3, %v973_v11 }
 0x1a3   : > { %1801 = vmatmul.msk.f32.gmra.mxu0 %vm926_vm3, %v1215_v40  ;;  %1817 = vmatmul.msk.f32.gmra.mxu1 %vm441_vm2, %v1399_v41 }
 0x1a6   : > { %1771 = vmatmul.msk.f32.gmra.mxu3 %vm926_vm3, %v974_v12  ;;  %v1409_v12 = vld [vmem:[%s2004_s23 + $0x70] sm:$0xff] }
 0x1ab   : > { %1802 = vmatmul.msk.f32.gmra.mxu0 %vm926_vm3, %v1216_v43  ;;  %1818 = vmatmul.msk.f32.gmra.mxu1 %vm441_vm2, %v1400_v44 }
 0x1ae   : > { %1772 = vmatmul.msk.f32.gmra.mxu3 %vm926_vm3, %v975_v13  ;;  %v960_v13 = vld [vmem:[#allocation3 + $0x64] sm:$0xff] }
 0x1b3   : > { %1803 = vmatmul.msk.f32.gmra.mxu0 %vm926_vm3, %v1217_v46  ;;  %1819 = vmatmul.msk.f32.gmra.mxu1 %vm441_vm2, %v1401_v48 }
 0x1b6   : > { %1773 = vmatmul.msk.f32.gmra.mxu3 %vm926_vm3, %v976_v14  ;;  %v1226_v14 = vld [vmem:[#allocation3 + $0x80] sm:$0xff] }
 0x1bb   : > { %1804 = vmatmul.msk.f32.gmra.mxu0 %vm926_vm3, %v1218_v50  ;;  %1820 = vmatmul.msk.f32.gmra.mxu1 %vm441_vm2, %v1402_v52 }
 0x1be   : > { %1774 = vmatmul.msk.f32.gmra.mxu3 %vm926_vm3, %v977_v16 }
 0x1c3   : > { %1805 = vmatmul.msk.f32.gmra.mxu0 %vm926_vm3, %v1219_v54  ;;  %1821 = vmatmul.msk.f32.gmra.mxu1 %vm441_vm2, %v1403_v56 }
 0x1c6   : > { %1775 = vmatmul.msk.f32.gmra.mxu3 %vm926_vm3, %v978_v18  ;;  %v961_v18 = vld [vmem:[#allocation3 + $0x6c] sm:$0xff] }
 0x1cb   : > { %1806 = vmatmul.msk.f32.gmra.mxu0 %vm926_vm3, %v1220_v58  ;;  %1822 = vmatmul.msk.f32.gmra.mxu1 %vm441_vm2, %v1404_v60 }
 0x1ce   : > { %1776 = vmatmul.msk.f32.gmra.mxu3 %vm926_vm3, %v979_v23  ;;  %v962_v23 = vld [vmem:[#allocation3 + $0x74] sm:$0xff] }
 0x1d3   : > { %1807 = vmatmul.msk.f32.gmra.mxu0 %vm926_vm3, %v1221_v62  ;;  %1823 = vmatmul.msk.f32.gmra.mxu1 %vm441_vm2, %v1405_v0 }
 0x1d6   : > { %1777 = vmatmul.msk.f32.gmra.mxu3 %vm926_vm3, %v980_v30 }
 0x1db   : > { %1808 = vmatmul.msk.f32.gmra.mxu0 %vm926_vm3, %v1222_v10  ;;  %1824 = vmatmul.msk.f32.gmra.mxu1 %vm441_vm2, %v1406_v3 }
 0x1de   : > { %1778 = vmatmul.msk.f32.gmra.mxu3 %vm926_vm3, %v981_v33 }
 0x1e3   : > { %1809 = vmatmul.msk.f32.gmra.mxu0 %vm926_vm3, %v1223_v15  ;;  %1825 = vmatmul.msk.f32.gmra.mxu1 %vm441_vm2, %v1407_v25 }
 0x1e6   : > { %1779 = vmatmul.msk.f32.vlgmr.msrb.gmra.mxu3 %vm926_vm3, %v948_v36 }
 0x1eb   : > { %1810 = vmatmul.msk.f32.gmra.mxu0 %vm926_vm3, %v1224_v5  ;;  %1826 = vmatmul.msk.f32.gmra.mxu1 %vm441_vm2, %v1408_v7 }
 0x1ee   : > { %1780 = vmatmul.msk.f32.gmra.mxu3 %vm926_vm3, %v949_v39 }
 0x1f3   : > { %1811 = vmatmul.msk.f32.gmra.mxu0 %vm926_vm3, %v1225_v9  ;;  %1827 = vmatmul.msk.f32.gmra.mxu1 %vm441_vm2, %v1409_v12 }
 0x1f6   : > { %1781 = vmatmul.msk.f32.gmra.mxu3 %vm926_vm3, %v950_v42 }
 0x1fb   : > { %1812 = vmatmul.msk.f32.gmra.mxu0 %vm926_vm3, %v1226_v14  ;;  %1828 = vmatmul.msk.f32.gmra.mxu1 %vm441_vm2, %v1410_v17 }
 0x1fe   : > { %1782 = vmatmul.msk.f32.gmra.mxu3 %vm926_vm3, %v951_v45 }
 0x200   : > { %v1295_v19 = vpop.f32.mrf.mxu0  ;;  %v1481_v21 = vpop.f32.mrf.mxu1 }
 0x201   : > { %v2224_v47 = vpop.f32.mrf.mxu3  ;;  %v1482_v43 = vadd.f32 %v2299_v38, %v1481_v21 }
 0x204   : > { %v1050_v33 = vpop.f32.mrf.mxu2 }
 0x206   : > { %1783 = vmatmul.msk.f32.gmra.mxu3 %vm926_vm3, %v952_v49 }
 0x208   : > { %v1298_v24 = vpop.f32.mrf.mxu0  ;;  %v1484_v26 = vpop.f32.mrf.mxu1 }
 0x209   : > { %v2230_v51 = vpop.f32.mrf.mxu3  ;;  %v1485_v56 = vadd.f32 %v2299_v38, %v1484_v26 }
 0x20c   : > { %v1053_v41 = vpop.f32.mrf.mxu2 }
 0x20e   : > { %1784 = vmatmul.msk.f32.gmra.mxu3 %vm926_vm3, %v953_v53 }
 0x210   : > { %v1301_v30 = vpop.f32.mrf.mxu0  ;;  %v1487_v32 = vpop.f32.mrf.mxu1 }
 0x211   : > { %v2236_v55 = vpop.f32.mrf.mxu3 }
 0x216   : > { %1785 = vmatmul.msk.f32.gmra.mxu3 %vm926_vm3, %v954_v57  ;;  %v1056_v57 = vpop.f32.mrf.mxu2 }
 0x218   : > { %v1304_v35 = vpop.f32.mrf.mxu0  ;;  %v1490_v39 = vpop.f32.mrf.mxu1 }
 0x219   : > { %v2242_v59 = vpop.f32.mrf.mxu3 }
 0x21e   : > { %1786 = vmatmul.msk.f32.gmra.mxu3 %vm926_vm3, %v955_v61 }
 0x220   : > { %v1307_v49 = vpop.f32.mrf.mxu0  ;;  %v1493_v53 = vpop.f32.mrf.mxu1 }
 0x221   : > { %v2248_v63 = vpop.f32.mrf.mxu3 }
 0x226   : > { %1787 = vmatmul.msk.f32.gmra.mxu3 %vm926_vm3, %v956_v1 }
 0x228   : > { %v1310_v10 = vpop.f32.mrf.mxu0  ;;  %v1496_v15 = vpop.f32.mrf.mxu1 }
 0x229   : > { %v2254_v2 = vpop.f32.mrf.mxu3 }
 0x22e   : > { %1788 = vmatmul.msk.f32.gmra.mxu3 %vm926_vm3, %v957_v4  ;;  %v1488_v4 = vadd.f32 %v2299_v38, %v1487_v32 }
 0x230   : > { %v1313_v14 = vpop.f32.mrf.mxu0 }
 0x231   : > { %v2260_v20 = vpop.f32.mrf.mxu3 }
 0x236   : > { %1789 = vmatmul.msk.f32.gmra.mxu3 %vm926_vm3, %v958_v28 }
 0x239   : > { %v2266_v6 = vpop.f32.mrf.mxu3 }
 0x23e   : > { %1790 = vmatmul.msk.f32.gmra.mxu3 %vm926_vm3, %v959_v8 }
 0x241   : > { %v2272_v11 = vpop.f32.mrf.mxu3 }
 0x246   : > { %1791 = vmatmul.msk.f32.gmra.mxu3 %vm926_vm3, %v960_v13  ;;  %v1491_v13 = vadd.f32 %v2299_v38, %v1490_v39 }
 0x249   : > { %v2278_v16 = vpop.f32.mrf.mxu3 }
 0x24e   : > { %1792 = vmatmul.msk.f32.gmra.mxu3 %vm926_vm3, %v961_v18 }
 0x251   : > { %v2283_v22 = vpop.f32.mrf.mxu3 }
 0x256   : > { %1793 = vmatmul.msk.f32.gmra.mxu3 %vm926_vm3, %v962_v23 }
 0x259   : > { %v2286_v27 = vpop.f32.mrf.mxu3 }
 0x25e   : > { %1794 = vmatmul.msk.f32.gmra.mxu3 %vm926_vm3, %v963_v29  ;;  %v1494_v29 = vadd.f32 %v2299_v38, %v1493_v53 }
 0x261   : > { %v2289_v31 = vpop.f32.mrf.mxu3 }
 0x269   : > { %v1163_v34 = vpop.f32.mrf.mxu3 }
 0x26a   : > { %v1164_v36 = vadd.f32 %v1163_v34, %v1050_v33  ;;  %v1316_v33 = vpop.f32.mrf.mxu0 }
 0x26c   : > { %v1343_v40 = vadd.f32 %v1295_v19, %v1164_v36  ;;  %v1499_v19 = vpop.f32.mrf.mxu1 }
 0x26e   : > { %v1363_v42 = vadd.f32 %v2294_v37, %v1343_v40 }
 0x270   : > { %v1379_v44 = vmax.f32 %v1363_v42, 0.0 }
 0x271   : > { %v1166_v45 = vpop.f32.mrf.mxu3 }
 0x272   : > { %v1529_v46 = vadd.f32 %v1482_v43, %v1379_v44  ;;  %v1167_v48 = vadd.f32 %v1166_v45, %v1053_v41  ;;  %v1497_v41 = vadd.f32 %v2299_v38, %v1496_v15 }
 0x274   : > { %v1545_v50 = vmax.f32 %v1529_v46, 0.0  ;;  %v1344_v52 = vadd.f32 %v1298_v24, %v1167_v48  ;;  %v1502_v36 = vpop.f32.mrf.mxu1  ;;  %v1319_v46 = vpop.f32.mrf.mxu0 }
 0x276   : > { %1561 = vst.msk [vmem:[%s2012_s13] sm:$0xff] %vm926_vm3, %v1545_v50  ;;  %v1364_v54 = vadd.f32 %v2294_v37, %v1344_v52  ;;  %v1500_v52 = vadd.f32 %v2299_v38, %v1499_v19 }
 0x278   : > { %v1380_v58 = vmax.f32 %v1364_v54, 0.0 }
 0x279   : > { %v1169_v60 = vpop.f32.mrf.mxu3 }
 0x27a   : > { %v1530_v61 = vadd.f32 %v1485_v56, %v1380_v58  ;;  %v1170_v62 = vadd.f32 %v1169_v60, %v1056_v57 }
 0x27c   : > { %v1546_v0 = vmax.f32 %v1530_v61, 0.0  ;;  %v1345_v1 = vadd.f32 %v1301_v30, %v1170_v62  ;;  %v1505_v50 = vpop.f32.mrf.mxu1  ;;  %v1322_v61 = vpop.f32.mrf.mxu0  ;;  %v1503_v62 = vadd.f32 %v2299_v38, %v1502_v36 }
 0x27e   : > { %1562 = vst.msk [vmem:[%s2012_s13 + $0x8] sm:$0xff] %vm926_vm3, %v1546_v0  ;;  %v1365_v3 = vadd.f32 %v2294_v37, %v1345_v1 }
 0x280   : > { %v1381_v25 = vmax.f32 %v1365_v3, 0.0 }
 0x281   : > { %v1172_v28 = vpop.f32.mrf.mxu3 }
 0x282   : > { %v1531_v5 = vadd.f32 %v1488_v4, %v1381_v25  ;;  %v1173_v7 = vadd.f32 %v1172_v28, %v2224_v47  ;;  %v1506_v28 = vadd.f32 %v2299_v38, %v1505_v50 }
 0x284   : > { %v1547_v8 = vmax.f32 %v1531_v5, 0.0  ;;  %v1346_v9 = vadd.f32 %v1304_v35, %v1173_v7  ;;  %v1508_v0 = vpop.f32.mrf.mxu1  ;;  %v1325_v5 = vpop.f32.mrf.mxu0 }
 0x286   : > { %1563 = vst.msk [vmem:[%s2012_s13 + $0x10] sm:$0xff] %vm926_vm3, %v1547_v8  ;;  %v1366_v12 = vadd.f32 %v2294_v37, %v1346_v9 }
 0x288   : > { %v1382_v17 = vmax.f32 %v1366_v12, 0.0 }
 0x289   : > { %v1175_v18 = vpop.f32.mrf.mxu3 }
 0x28a   : > { %v1532_v21 = vadd.f32 %v1491_v13, %v1382_v17  ;;  %v1176_v23 = vadd.f32 %v1175_v18, %v2230_v51  ;;  %v1509_v18 = vadd.f32 %v2299_v38, %v1508_v0 }
 0x28c   : > { %v1548_v24 = vmax.f32 %v1532_v21, 0.0  ;;  %v1347_v26 = vadd.f32 %v1307_v49, %v1176_v23  ;;  %v1511_v9 = vpop.f32.mrf.mxu1  ;;  %v1328_v23 = vpop.f32.mrf.mxu0 }
 0x28e   : > { %1564 = vst.msk [vmem:[%s2012_s13 + $0x18] sm:$0xff] %vm926_vm3, %v1548_v24  ;;  %v1367_v47 = vadd.f32 %v2294_v37, %v1347_v26 }
 0x290   : > { %v1383_v30 = vmax.f32 %v1367_v47, 0.0 }
 0x291   : > { %v1178_v32 = vpop.f32.mrf.mxu3 }
 0x292   : > { %v1533_v34 = vadd.f32 %v1494_v29, %v1383_v30  ;;  %v1179_v35 = vadd.f32 %v1178_v32, %v2236_v55  ;;  %v1512_v32 = vadd.f32 %v2299_v38, %v1511_v9 }
 0x294   : > { %v1549_v39 = vmax.f32 %v1533_v34, 0.0  ;;  %v1348_v40 = vadd.f32 %v1310_v10, %v1179_v35  ;;  %v1514_v47 = vpop.f32.mrf.mxu1 }
 0x296   : > { %1565 = vst.msk [vmem:[%s2012_s13 + $0x20] sm:$0xff] %vm926_vm3, %v1549_v39  ;;  %v1368_v51 = vadd.f32 %v2294_v37, %v1348_v40  ;;  %v1331_v39 = vpop.f32.mrf.mxu0 }
 0x298   : > { %v1384_v42 = vmax.f32 %v1368_v51, 0.0 }
 0x299   : > { %v1181_v43 = vpop.f32.mrf.mxu3 }
 0x29a   : > { %v1534_v44 = vadd.f32 %v1497_v41, %v1384_v42  ;;  %v1182_v45 = vadd.f32 %v1181_v43, %v2242_v59  ;;  %v1515_v42 = vadd.f32 %v2299_v38, %v1514_v47 }
 0x29c   : > { %v1550_v48 = vmax.f32 %v1534_v44, 0.0  ;;  %v1349_v49 = vadd.f32 %v1313_v14, %v1182_v45  ;;  %v1517_v41 = vpop.f32.mrf.mxu1 }
 0x29e   : > { %1566 = vst.msk [vmem:[%s2012_s13 + $0x28] sm:$0xff] %vm926_vm3, %v1550_v48  ;;  %v1369_v55 = vadd.f32 %v2294_v37, %v1349_v49  ;;  %v1334_v50 = vpop.f32.mrf.mxu0 }
 0x2a0   : > { %v1385_v53 = vmax.f32 %v1369_v55, 0.0  ;;  %v1518_v55 = vadd.f32 %v2299_v38, %v1517_v41 }
 0x2a1   : > { %v1184_v54 = vpop.f32.mrf.mxu3 }
 0x2a2   : > { %v1535_v56 = vadd.f32 %v1500_v52, %v1385_v53  ;;  %v1185_v57 = vadd.f32 %v1184_v54, %v2248_v63 }
 0x2a4   : > { %v1551_v58 = vmax.f32 %v1535_v56, 0.0  ;;  %v1350_v60 = vadd.f32 %v1316_v33, %v1185_v57  ;;  %v1520_v52 = vpop.f32.mrf.mxu1 }
 0x2a6   : > { %1567 = vst.msk [vmem:[%s2012_s13 + $0x30] sm:$0xff] %vm926_vm3, %v1551_v58  ;;  %v1370_v59 = vadd.f32 %v2294_v37, %v1350_v60 }
 0x2a8   : > { %v1386_v1 = vmax.f32 %v1370_v59, 0.0  ;;  %v1337_v59 = vpop.f32.mrf.mxu0 }
 0x2a9   : > { %v1187_v10 = vpop.f32.mrf.mxu3 }
 0x2aa   : > { %v1536_v3 = vadd.f32 %v1503_v62, %v1386_v1  ;;  %v1188_v4 = vadd.f32 %v1187_v10, %v2254_v2 }
 0x2ac   : > { %v1552_v15 = vmax.f32 %v1536_v3, 0.0  ;;  %v1351_v25 = vadd.f32 %v1319_v46, %v1188_v4  ;;  %v1523_v1 = vpop.f32.mrf.mxu1 }
 0x2ae   : > { %1568 = vst.msk [vmem:[%s2012_s13 + $0x38] sm:$0xff] %vm926_vm3, %v1552_v15  ;;  %v1371_v63 = vadd.f32 %v2294_v37, %v1351_v25  ;;  %v1524_v25 = vadd.f32 %v2299_v38, %v1523_v1 }
 0x2b0   : > { %v1387_v7 = vmax.f32 %v1371_v63, 0.0 }
 0x2b1   : > { %v1190_v8 = vpop.f32.mrf.mxu3 }
 0x2b2   : > { %v1537_v12 = vadd.f32 %v1506_v28, %v1387_v7  ;;  %v1191_v13 = vadd.f32 %v1190_v8, %v2260_v20 }
 0x2b4   : > { %v1553_v14 = vmax.f32 %v1537_v12, 0.0  ;;  %v1352_v17 = vadd.f32 %v1322_v61, %v1191_v13  ;;  %v1521_v61 = vadd.f32 %v2299_v38, %v1520_v52  ;;  %v1526_v9 = vpop.f32.mrf.mxu1 }
 0x2b6   : > { %1569 = vst.msk [vmem:[%s2012_s13 + $0x40] sm:$0xff] %vm926_vm3, %v1553_v14  ;;  %v1372_v2 = vadd.f32 %v2294_v37, %v1352_v17  ;;  %v1527_v14 = vadd.f32 %v2299_v38, %v1526_v9 }
 0x2b8   : > { %v1388_v19 = vmax.f32 %v1372_v2, 0.0 }
 0x2b9   : > { %v1193_v21 = vpop.f32.mrf.mxu3 }
 0x2ba   : > { %v1538_v24 = vadd.f32 %v1509_v18, %v1388_v19  ;;  %v1194_v26 = vadd.f32 %v1193_v21, %v2266_v6 }
 0x2bc   : > { %v1554_v29 = vmax.f32 %v1538_v24, 0.0  ;;  %v1353_v30 = vadd.f32 %v1325_v5, %v1194_v26  ;;  %v1340_v5 = vpop.f32.mrf.mxu0 }
 0x2be   : > { %1570 = vst.msk [vmem:[%s2012_s13 + $0x48] sm:$0xff] %vm926_vm3, %v1554_v29  ;;  %v1373_v20 = vadd.f32 %v2294_v37, %v1353_v30 }
 0x2c0   : > { %v1389_v33 = vmax.f32 %v1373_v20, 0.0 }
 0x2c1   : > { %v1196_v34 = vpop.f32.mrf.mxu3 }
 0x2c2   : > { %v1539_v35 = vadd.f32 %v1512_v32, %v1389_v33  ;;  %v1197_v36 = vadd.f32 %v1196_v34, %v2272_v11 }
 0x2c4   : > { %v1555_v40 = vmax.f32 %v1539_v35, 0.0  ;;  %v1354_v51 = vadd.f32 %v1328_v23, %v1197_v36 }
 0x2c6   : > { %1571 = vst.msk [vmem:[%s2012_s13 + $0x50] sm:$0xff] %vm926_vm3, %v1555_v40  ;;  %v1374_v6 = vadd.f32 %v2294_v37, %v1354_v51 }
 0x2c8   : > { %v1390_v43 = vmax.f32 %v1374_v6, 0.0 }
 0x2c9   : > { %v1199_v44 = vpop.f32.mrf.mxu3 }
 0x2ca   : > { %v1540_v45 = vadd.f32 %v1515_v42, %v1390_v43  ;;  %v1200_v46 = vadd.f32 %v1199_v44, %v2278_v16 }
 0x2cc   : > { %v1556_v48 = vmax.f32 %v1540_v45, 0.0  ;;  %v1355_v49 = vadd.f32 %v1331_v39, %v1200_v46 }
 0x2ce   : > { %1572 = vst.msk [vmem:[%s2012_s13 + $0x58] sm:$0xff] %vm926_vm3, %v1556_v48  ;;  %v1375_v11 = vadd.f32 %v2294_v37, %v1355_v49 }
 0x2d0   : > { %v1391_v53 = vmax.f32 %v1375_v11, 0.0 }
 0x2d1   : > { %v1202_v54 = vpop.f32.mrf.mxu3 }
 0x2d2   : > { %v1541_v56 = vadd.f32 %v1518_v55, %v1391_v53  ;;  %v1203_v57 = vadd.f32 %v1202_v54, %v2283_v22 }
 0x2d4   : > { %v1557_v58 = vmax.f32 %v1541_v56, 0.0  ;;  %v1356_v60 = vadd.f32 %v1334_v50, %v1203_v57 }
 0x2d6   : > { %1573 = vst.msk [vmem:[%s2012_s13 + $0x60] sm:$0xff] %vm926_vm3, %v1557_v58  ;;  %v1376_v16 = vadd.f32 %v2294_v37, %v1356_v60 }
 0x2d8   : > { %v1392_v62 = vmax.f32 %v1376_v16, 0.0 }
 0x2d9   : > { %v1205_v0 = vpop.f32.mrf.mxu3 }
 0x2da   : > { %v1542_v10 = vadd.f32 %v1521_v61, %v1392_v62  ;;  %v1206_v3 = vadd.f32 %v1205_v0, %v2286_v27 }
 0x2dc   : > { %v1558_v4 = vmax.f32 %v1542_v10, 0.0  ;;  %v1357_v15 = vadd.f32 %v1337_v59, %v1206_v3 }
 0x2de   : > { %1574 = vst.msk [vmem:[%s2012_s13 + $0x68] sm:$0xff] %vm926_vm3, %v1558_v4  ;;  %v1377_v22 = vadd.f32 %v2294_v37, %v1357_v15 }
 0x2e0   : > { %v1393_v63 = vmax.f32 %v1377_v22, 0.0 }
 0x2e1   : > { %v1208_v28 = vpop.f32.mrf.mxu3 }
 0x2e2   : > { %v1543_v7 = vadd.f32 %v1524_v25, %v1393_v63  ;;  %v1209_v8 = vadd.f32 %v1208_v28, %v2289_v31 }
 0x2e4   : > { %v1559_v12 = vmax.f32 %v1543_v7, 0.0  ;;  %v1358_v13 = vadd.f32 %v1340_v5, %v1209_v8 }
 0x2e6   : > { %1575 = vst.msk [vmem:[%s2012_s13 + $0x70] sm:$0xff] %vm926_vm3, %v1559_v12  ;;  %v1378_v27 = vadd.f32 %v2294_v37, %v1358_v13 }
 0x2e8   : > { %v1394_v17 = vmax.f32 %v1378_v27, 0.0 }
 0x2ea   : > { %v1544_v2 = vadd.f32 %v1527_v14, %v1394_v17 }
 0x2ec   : > { %v1560_v18 = vmax.f32 %v1544_v2, 0.0 }
 0x2ee   : > { %1576 = vst.msk [vmem:[%s2012_s13 + $0x78] sm:$0xff] %vm926_vm3, %v1560_v18 }
 0x2ef PF: > { %s18_s9 = sadd.s32 1, %s1918_s9   ;;  %s2403_s21 = sld [smem:[#allocation4_spill]] }
 0x2f0   : > { %p15_p11 = scmp.ge.s32.totalorder %s18_s9, 6   ;;  %s2404_s27 = smov %s1910_s29 }
 0x2f1   : > { %s2405_s28 = smov %s1914_s30  ;;  %s2406_s29 = smov %s2409_s10 }
 0x2f2   :  { %17 = sbr.rel (!%p15_p11) target bundleno = 3 (0x3), region = 101 }
 0x2f5   : > { %s2407_s30 = smov %s2403_s21 }

</bundles_post_ra>
